<compile_context>
chip_gen: v5e
topology: v5e:2x2
jax: 0.10.0
libtpu: 0.0.40
codegen_flags: <defaults>
</compile_context>

<pallas_src>
import functools
import math

import jax
import jax.numpy as jnp
from jax.experimental import pallas as pl
from jax.experimental.pallas import tpu as pltpu


def _layer_norm(v, gamma, beta, eps=1e-5):
    # Two-pass (centered) variance, biased — matches torch.nn.LayerNorm.
    mean = jnp.mean(v, axis=-1, keepdims=True)
    centered = v - mean
    var = jnp.mean(centered * centered, axis=-1, keepdims=True)
    return centered * jax.lax.rsqrt(var + eps) * gamma + beta


def transformer_layer_kernel(
    x_ref,
    wq_ref, bq_ref, wk_ref, bk_ref, wv_ref, bv_ref, wo_ref, bo_ref,
    g1_ref, be1_ref, w1_ref, b1_ref, w2_ref, b2_ref, g2_ref, be2_ref,
    out_ref,
    k_heads, v_heads,
    *, n_heads, tile_s,
):
    f32, bf16 = jnp.float32, jnp.bfloat16
    s_len, d = x_ref.shape
    hd = d // n_heads
    si = pl.program_id(1)

    # ---- K/V projections: computed ONCE per batch, reused by every query tile -----------
    @pl.when(si == 0)
    def _():
        x_all = x_ref[...].astype(bf16)                                     # (S, D)
        k2 = jnp.dot(x_all, wk_ref[...], preferred_element_type=f32) + bk_ref[...]
        v2 = jnp.dot(x_all, wv_ref[...], preferred_element_type=f32) + bv_ref[...]
        # Head-major relayout into scratch (static lane slices; tile-aligned when hd % 128 == 0).
        for h in range(n_heads):
            k_heads[h] = k2[:, h * hd:(h + 1) * hd].astype(bf16)
            v_heads[h] = v2[:, h * hd:(h + 1) * hd].astype(bf16)

    # ---- query tile: sliced from the resident sequence block (no duplicate x input) -----
    row0 = pl.multiple_of(si * tile_s, tile_s)
    xq = x_ref[pl.ds(row0, tile_s), :]                                      # (Tq, D) f32

    # Q projection: one full-width matmul; 1/sqrt(hd) already folded into wq/bq host-side.
    q2 = jnp.dot(xq.astype(bf16), wq_ref[...], preferred_element_type=f32) + bq_ref[...]
    q3 = jnp.stack([q2[:, h * hd:(h + 1) * hd] for h in range(n_heads)],
                   axis=0).astype(bf16)                                     # (H, Tq, hd)

    # ---- scaled dot-product attention, all heads batched ---------------------------------
    # TODO(synk): flash-style online softmax over K/V tiles for very long S (v7x 64 MiB VMEM).
    scores = jnp.einsum("hqd,hkd->hqk", q3, k_heads[...],
                        preferred_element_type=f32)                         # (H, Tq, S)
    scores = scores - jnp.max(scores, axis=-1, keepdims=True)
    p = jnp.exp(scores)
    p = (p * pl.reciprocal(jnp.sum(p, axis=-1, keepdims=True), approx=True)).astype(bf16)
    ctx = jnp.einsum("hqk,hkd->hqd", p, v_heads[...],
                     preferred_element_type=f32)                            # (H, Tq, hd)

    # ---- output projection: merge heads back to (Tq, D), one (Tq,D)@(D,D) matmul ---------
    ctx2 = jnp.concatenate([ctx[h] for h in range(n_heads)], axis=-1)       # (Tq, D)
    attn = jnp.dot(ctx2.astype(bf16), wo_ref[...], preferred_element_type=f32) + bo_ref[...]

    # ---- residual + LayerNorm 1 (dropout = identity, eval mode) --------------------------
    h1 = _layer_norm(xq + attn, g1_ref[...], be1_ref[...])

    # ---- feed-forward ---------------------------------------------------------------------
    ff = jnp.dot(h1.astype(bf16), w1_ref[...], preferred_element_type=f32) + b1_ref[...]
    ff = jnp.maximum(ff, 0.0)
    ff = jnp.dot(ff.astype(bf16), w2_ref[...], preferred_element_type=f32) + b2_ref[...]

    # ---- residual + LayerNorm 2 -----------------------------------------------------------
    out_ref[...] = _layer_norm(h1 + ff, g2_ref[...], be2_ref[...])


def transformer_layer(x, params, n_heads):
    B, S, D = x.shape
    hd = D // n_heads
    assert hd * n_heads == D, "model_dim must be divisible by n_heads"
    f32, bf16 = jnp.float32, jnp.bfloat16
    scale = 1.0 / math.sqrt(hd)

    # ---- host-side weight prep: bf16 matmul operands, f32 biases, softmax scale folded ---
    param_list = [
        (params["wq"] * scale).astype(bf16), (params["bq"] * scale).astype(f32),
        params["wk"].astype(bf16), params["bk"].astype(f32),
        params["wv"].astype(bf16), params["bv"].astype(f32),
        params["wo"].astype(bf16), params["bo"].astype(f32),
        params["g1"].astype(f32), params["be1"].astype(f32),
        params["w1"].astype(bf16), params["b1"].astype(f32),
        params["w2"].astype(bf16), params["b2"].astype(f32),
        params["g2"].astype(f32), params["be2"].astype(f32),
    ]

    # ---- VMEM budget re-derived per chip (v5e/v6e: 128 MiB, v7x: 64 MiB per TensorCore) ---
    try:
        vmem_cap = int(pltpu.get_tpu_info().vmem_capacity_bytes)
    except Exception:
        vmem_cap = 64 * 1024 * 1024
    vmem_limit = min(int(vmem_cap * 0.8), 100 * 1024 * 1024)

    # Query-tile size: larger tiles amortize per-grid-step overhead; 512 only when VMEM allows.
    if S <= 256:
        tile_s = S
    elif vmem_limit >= 96 * 1024 * 1024 and S % 512 == 0:
        tile_s = 512
    else:
        tile_s = 256
    assert S % tile_s == 0, "sequence length must be a multiple of the query tile"
    grid = (B, S // tile_s)

    # x is passed ONCE: full (S, D) sequence resident per batch; query tiles sliced in-kernel.
    x_spec = pl.BlockSpec((pl.Squeezed(), S, D), lambda b, si: (b, 0, 0))
    out_spec = pl.BlockSpec((pl.Squeezed(), tile_s, D), lambda b, si: (b, si, 0))

    def run(single_buffer_weights):
        def weight_spec(a):
            nd = a.ndim
            kwargs = {}
            if single_buffer_weights:
                # Constant index_map -> block never changes; one buffer is enough (saves VMEM).
                kwargs["pipeline_mode"] = pl.Buffered(1)
            return pl.BlockSpec(a.shape, lambda *_: (0,) * nd, **kwargs)

        return pl.pallas_call(
            functools.partial(transformer_layer_kernel, n_heads=n_heads, tile_s=tile_s),
            out_shape=jax.ShapeDtypeStruct((B, S, D), f32),
            grid_spec=pltpu.PrefetchScalarGridSpec(
                num_scalar_prefetch=0,
                grid=grid,
                in_specs=[x_spec] + [weight_spec(p) for p in param_list],
                out_specs=out_spec,
                scratch_shapes=[
                    pltpu.VMEM((n_heads, S, hd), bf16),   # K, head-major, one batch
                    pltpu.VMEM((n_heads, S, hd), bf16),   # V, head-major, one batch
                ],
            ),
            compiler_params=pltpu.CompilerParams(
                # K/V scratch is carried across seq tiles -> "arbitrary";
                # batch axis stays "parallel" to balance the two v7x TensorCores.
                dimension_semantics=("parallel", "arbitrary"),
                vmem_limit_bytes=vmem_limit,
            ),
        )(x, *param_list)

    try:
        return run(single_buffer_weights=True)
    except Exception:
        # TODO(synk): pl.Buffered(1) (single-buffered constant weights) not accepted by this
        # jax version; fall back to the default double-buffered weight blocks.
        return run(single_buffer_weights=False)


def reference(x, params, n_heads):
    B, S, D = x.shape
    hd = D // n_heads

    def ln(v, g, b, eps=1e-5):
        m = jnp.mean(v, -1, keepdims=True)
        var = jnp.mean((v - m) ** 2, -1, keepdims=True)
        return (v - m) / jnp.sqrt(var + eps) * g + b

    q = x @ params["wq"] + params["bq"]
    k = x @ params["wk"] + params["bk"]
    v = x @ params["wv"] + params["bv"]
    q = q.reshape(B, S, n_heads, hd).transpose(0, 2, 1, 3)
    k = k.reshape(B, S, n_heads, hd).transpose(0, 2, 1, 3)
    v = v.reshape(B, S, n_heads, hd).transpose(0, 2, 1, 3)
    s = jnp.einsum("bhqd,bhkd->bhqk", q, k) / math.sqrt(hd)
    p = jax.nn.softmax(s, axis=-1)
    o = jnp.einsum("bhqk,bhkd->bhqd", p, v).transpose(0, 2, 1, 3).reshape(B, S, D)
    o = o @ params["wo"] + params["bo"]
    h1 = ln(x + o, params["g1"], params["be1"])
    ff = jnp.maximum(h1 @ params["w1"] + params["b1"], 0.0) @ params["w2"] + params["b2"]
    return ln(h1 + ff, params["g2"], params["be2"])


if __name__ == "__main__":
    # NOTE: small shapes for the self-check; they exercise correctness, not the (8,128)
    # tiling / VMEM-pressure paths (validate at D>=512, S>=1024 before trusting perf numbers).
    B, S, D, H = 2, 8, 32, 4
    FF = 2 * D

    key = jax.random.PRNGKey(0)
    keys = jax.random.split(key, 16)
    init = lambda k, shp: (0.02 * jax.random.normal(k, shp)).astype(jnp.float32)

    params = {
        "wq": init(keys[0], (D, D)),  "bq": init(keys[1], (1, D)),
        "wk": init(keys[2], (D, D)),  "bk": init(keys[3], (1, D)),
        "wv": init(keys[4], (D, D)),  "bv": init(keys[5], (1, D)),
        "wo": init(keys[6], (D, D)),  "bo": init(keys[7], (1, D)),
        "g1": jnp.ones((1, D), jnp.float32), "be1": jnp.zeros((1, D), jnp.float32),
        "w1": init(keys[8], (D, FF)), "b1": init(keys[9], (1, FF)),
        "w2": init(keys[10], (FF, D)), "b2": init(keys[11], (1, D)),
        "g2": jnp.ones((1, D), jnp.float32), "be2": jnp.zeros((1, D), jnp.float32),
    }

    x = jax.random.normal(keys[12], (B, S, D), dtype=jnp.float32)

    out = transformer_layer(x, params, n_heads=H)
    out = jax.block_until_ready(out)

    ref = reference(x, params, n_heads=H)
    max_err = float(jnp.max(jnp.abs(out - ref)))
    # bf16 matmul operands (f32 accumulation) + approx softmax reciprocal -> relaxed tolerance.
    assert jnp.allclose(out, ref, atol=1e-2, rtol=1e-2), f"mismatch vs reference, max abs err={max_err}"

    print("KERNEL_OK")
</pallas_src>

<mosaic_0001>
module attributes {stable_mosaic.version = 11 : i64} {
  func.func @transformer_layer_kernel(%arg0: i32, %arg1: i32, %arg2: memref<1x8x32xf32, #tpu.memory_space<vmem>>, %arg3: memref<32x32xbf16, #tpu.memory_space<vmem>>, %arg4: memref<1x32xf32, #tpu.memory_space<vmem>>, %arg5: memref<32x32xbf16, #tpu.memory_space<vmem>>, %arg6: memref<1x32xf32, #tpu.memory_space<vmem>>, %arg7: memref<32x32xbf16, #tpu.memory_space<vmem>>, %arg8: memref<1x32xf32, #tpu.memory_space<vmem>>, %arg9: memref<32x32xbf16, #tpu.memory_space<vmem>>, %arg10: memref<1x32xf32, #tpu.memory_space<vmem>>, %arg11: memref<1x32xf32, #tpu.memory_space<vmem>>, %arg12: memref<1x32xf32, #tpu.memory_space<vmem>>, %arg13: memref<32x64xbf16, #tpu.memory_space<vmem>>, %arg14: memref<1x64xf32, #tpu.memory_space<vmem>>, %arg15: memref<64x32xbf16, #tpu.memory_space<vmem>>, %arg16: memref<1x32xf32, #tpu.memory_space<vmem>>, %arg17: memref<1x32xf32, #tpu.memory_space<vmem>>, %arg18: memref<1x32xf32, #tpu.memory_space<vmem>>, %arg19: memref<1x8x32xf32, #tpu.memory_space<vmem>>, %arg20: memref<4x8x8xbf16, #tpu.memory_space<vmem>>, %arg21: memref<4x8x8xbf16, #tpu.memory_space<vmem>>) attributes {dimension_semantics = [#tpu.dimension_semantics<parallel>, #tpu.dimension_semantics<arbitrary>], iteration_bounds = array<i64: 2, 1>, scalar_prefetch = 0 : i64, scratch_operands = 2 : i64, tpu.core_type = #tpu.core_type<tc>, window_params = [{transform_indices = @transform_0, window_bounds = array<i64: 1, 8, 32>}, {pipeline_mode = #tpu.pipeline_mode<synchronous>, transform_indices = @transform_1, window_bounds = array<i64: 32, 32>}, {pipeline_mode = #tpu.pipeline_mode<synchronous>, transform_indices = @transform_2, window_bounds = array<i64: 1, 32>}, {pipeline_mode = #tpu.pipeline_mode<synchronous>, transform_indices = @transform_3, window_bounds = array<i64: 32, 32>}, {pipeline_mode = #tpu.pipeline_mode<synchronous>, transform_indices = @transform_4, window_bounds = array<i64: 1, 32>}, {pipeline_mode = #tpu.pipeline_mode<synchronous>, transform_indices = @transform_5, window_bounds = array<i64: 32, 32>}, {pipeline_mode = #tpu.pipeline_mode<synchronous>, transform_indices = @transform_6, window_bounds = array<i64: 1, 32>}, {pipeline_mode = #tpu.pipeline_mode<synchronous>, transform_indices = @transform_7, window_bounds = array<i64: 32, 32>}, {pipeline_mode = #tpu.pipeline_mode<synchronous>, transform_indices = @transform_8, window_bounds = array<i64: 1, 32>}, {pipeline_mode = #tpu.pipeline_mode<synchronous>, transform_indices = @transform_9, window_bounds = array<i64: 1, 32>}, {pipeline_mode = #tpu.pipeline_mode<synchronous>, transform_indices = @transform_10, window_bounds = array<i64: 1, 32>}, {pipeline_mode = #tpu.pipeline_mode<synchronous>, transform_indices = @transform_11, window_bounds = array<i64: 32, 64>}, {pipeline_mode = #tpu.pipeline_mode<synchronous>, transform_indices = @transform_12, window_bounds = array<i64: 1, 64>}, {pipeline_mode = #tpu.pipeline_mode<synchronous>, transform_indices = @transform_13, window_bounds = array<i64: 64, 32>}, {pipeline_mode = #tpu.pipeline_mode<synchronous>, transform_indices = @transform_14, window_bounds = array<i64: 1, 32>}, {pipeline_mode = #tpu.pipeline_mode<synchronous>, transform_indices = @transform_15, window_bounds = array<i64: 1, 32>}, {pipeline_mode = #tpu.pipeline_mode<synchronous>, transform_indices = @transform_16, window_bounds = array<i64: 1, 32>}, {transform_indices = @transform_17, window_bounds = array<i64: 1, 8, 32>}]} {
    %c0_i32 = arith.constant 0 : i32
    %0 = arith.cmpi eq, %arg1, %c0_i32 : i32
    %1 = arith.extui %0 : i1 to i32
    %c0_i32_0 = arith.constant 0 : i32
    %2 = arith.cmpi ne, %1, %c0_i32_0 : i32
    scf.if %2 {
      %c0_53 = arith.constant 0 : index
      %c0_54 = arith.constant 0 : index
      %c0_55 = arith.constant 0 : index
      %117 = vector.load %arg2[%c0_53, %c0_54, %c0_55] : memref<1x8x32xf32, #tpu.memory_space<vmem>>, vector<1x8x32xf32>
      %118 = vector.shape_cast %117 : vector<1x8x32xf32> to vector<8x32xf32>
      %119 = arith.truncf %118 : vector<8x32xf32> to vector<8x32xbf16>
      %c0_56 = arith.constant 0 : index
      %c0_57 = arith.constant 0 : index
      %120 = vector.load %arg5[%c0_56, %c0_57] : memref<32x32xbf16, #tpu.memory_space<vmem>>, vector<32x32xbf16>
      %cst_58 = arith.constant dense<0.000000e+00> : vector<8x32xf32>
      %121 = tpu.matmul %119, %120, %cst_58 {dimension_numbers = #tpu.dot_dimension_numbers<[1], [0], [0], [1], [0, 0, 1, 1], [], []>} : vector<8x32xbf16>, vector<32x32xbf16>, vector<8x32xf32> -> vector<8x32xf32>
      %c0_59 = arith.constant 0 : index
      %c0_60 = arith.constant 0 : index
      %122 = vector.load %arg6[%c0_59, %c0_60] : memref<1x32xf32, #tpu.memory_space<vmem>>, vector<1x32xf32>
      %123 = vector.broadcast %122 : vector<1x32xf32> to vector<8x32xf32>
      %124 = arith.addf %121, %123 : vector<8x32xf32>
      %c0_61 = arith.constant 0 : index
      %c0_62 = arith.constant 0 : index
      %125 = vector.load %arg7[%c0_61, %c0_62] : memref<32x32xbf16, #tpu.memory_space<vmem>>, vector<32x32xbf16>
      %cst_63 = arith.constant dense<0.000000e+00> : vector<8x32xf32>
      %126 = tpu.matmul %119, %125, %cst_63 {dimension_numbers = #tpu.dot_dimension_numbers<[1], [0], [0], [1], [0, 0, 1, 1], [], []>} : vector<8x32xbf16>, vector<32x32xbf16>, vector<8x32xf32> -> vector<8x32xf32>
      %c0_64 = arith.constant 0 : index
      %c0_65 = arith.constant 0 : index
      %127 = vector.load %arg8[%c0_64, %c0_65] : memref<1x32xf32, #tpu.memory_space<vmem>>, vector<1x32xf32>
      %128 = vector.broadcast %127 : vector<1x32xf32> to vector<8x32xf32>
      %129 = arith.addf %126, %128 : vector<8x32xf32>
      %130 = vector.extract_strided_slice %124 {offsets = [0, 0], sizes = [8, 8], strides = [1, 1]} : vector<8x32xf32> to vector<8x8xf32>
      %131 = arith.truncf %130 : vector<8x8xf32> to vector<8x8xbf16>
      %c0_66 = arith.constant 0 : index
      %c0_67 = arith.constant 0 : index
      %c0_68 = arith.constant 0 : index
      %132 = vector.load %arg20[%c0_66, %c0_67, %c0_68] : memref<4x8x8xbf16, #tpu.memory_space<vmem>>, vector<1x8x8xbf16>
      %133 = vector.shape_cast %132 : vector<1x8x8xbf16> to vector<8x8xbf16>
      %134 = vector.shape_cast %131 : vector<8x8xbf16> to vector<1x8x8xbf16>
      tpu.vector_store %arg20[%c0_66, %c0_67, %c0_68], %134 {strides = array<i32>} : memref<4x8x8xbf16, #tpu.memory_space<vmem>>, vector<1x8x8xbf16>,
      %135 = vector.extract_strided_slice %129 {offsets = [0, 0], sizes = [8, 8], strides = [1, 1]} : vector<8x32xf32> to vector<8x8xf32>
      %136 = arith.truncf %135 : vector<8x8xf32> to vector<8x8xbf16>
      %c0_69 = arith.constant 0 : index
      %c0_70 = arith.constant 0 : index
      %c0_71 = arith.constant 0 : index
      %137 = vector.load %arg21[%c0_69, %c0_70, %c0_71] : memref<4x8x8xbf16, #tpu.memory_space<vmem>>, vector<1x8x8xbf16>
      %138 = vector.shape_cast %137 : vector<1x8x8xbf16> to vector<8x8xbf16>
      %139 = vector.shape_cast %136 : vector<8x8xbf16> to vector<1x8x8xbf16>
      tpu.vector_store %arg21[%c0_69, %c0_70, %c0_71], %139 {strides = array<i32>} : memref<4x8x8xbf16, #tpu.memory_space<vmem>>, vector<1x8x8xbf16>,
      %140 = vector.extract_strided_slice %124 {offsets = [0, 8], sizes = [8, 8], strides = [1, 1]} : vector<8x32xf32> to vector<8x8xf32>
      %141 = arith.truncf %140 : vector<8x8xf32> to vector<8x8xbf16>
      %c1 = arith.constant 1 : index
      %c0_72 = arith.constant 0 : index
      %c0_73 = arith.constant 0 : index
      %142 = vector.load %arg20[%c1, %c0_72, %c0_73] : memref<4x8x8xbf16, #tpu.memory_space<vmem>>, vector<1x8x8xbf16>
      %143 = vector.shape_cast %142 : vector<1x8x8xbf16> to vector<8x8xbf16>
      %144 = vector.shape_cast %141 : vector<8x8xbf16> to vector<1x8x8xbf16>
      tpu.vector_store %arg20[%c1, %c0_72, %c0_73], %144 {strides = array<i32>} : memref<4x8x8xbf16, #tpu.memory_space<vmem>>, vector<1x8x8xbf16>,
      %145 = vector.extract_strided_slice %129 {offsets = [0, 8], sizes = [8, 8], strides = [1, 1]} : vector<8x32xf32> to vector<8x8xf32>
      %146 = arith.truncf %145 : vector<8x8xf32> to vector<8x8xbf16>
      %c1_74 = arith.constant 1 : index
      %c0_75 = arith.constant 0 : index
      %c0_76 = arith.constant 0 : index
      %147 = vector.load %arg21[%c1_74, %c0_75, %c0_76] : memref<4x8x8xbf16, #tpu.memory_space<vmem>>, vector<1x8x8xbf16>
      %148 = vector.shape_cast %147 : vector<1x8x8xbf16> to vector<8x8xbf16>
      %149 = vector.shape_cast %146 : vector<8x8xbf16> to vector<1x8x8xbf16>
      tpu.vector_store %arg21[%c1_74, %c0_75, %c0_76], %149 {strides = array<i32>} : memref<4x8x8xbf16, #tpu.memory_space<vmem>>, vector<1x8x8xbf16>,
      %150 = vector.extract_strided_slice %124 {offsets = [0, 16], sizes = [8, 8], strides = [1, 1]} : vector<8x32xf32> to vector<8x8xf32>
      %151 = arith.truncf %150 : vector<8x8xf32> to vector<8x8xbf16>
      %c2 = arith.constant 2 : index
      %c0_77 = arith.constant 0 : index
      %c0_78 = arith.constant 0 : index
      %152 = vector.load %arg20[%c2, %c0_77, %c0_78] : memref<4x8x8xbf16, #tpu.memory_space<vmem>>, vector<1x8x8xbf16>
      %153 = vector.shape_cast %152 : vector<1x8x8xbf16> to vector<8x8xbf16>
      %154 = vector.shape_cast %151 : vector<8x8xbf16> to vector<1x8x8xbf16>
      tpu.vector_store %arg20[%c2, %c0_77, %c0_78], %154 {strides = array<i32>} : memref<4x8x8xbf16, #tpu.memory_space<vmem>>, vector<1x8x8xbf16>,
      %155 = vector.extract_strided_slice %129 {offsets = [0, 16], sizes = [8, 8], strides = [1, 1]} : vector<8x32xf32> to vector<8x8xf32>
      %156 = arith.truncf %155 : vector<8x8xf32> to vector<8x8xbf16>
      %c2_79 = arith.constant 2 : index
      %c0_80 = arith.constant 0 : index
      %c0_81 = arith.constant 0 : index
      %157 = vector.load %arg21[%c2_79, %c0_80, %c0_81] : memref<4x8x8xbf16, #tpu.memory_space<vmem>>, vector<1x8x8xbf16>
      %158 = vector.shape_cast %157 : vector<1x8x8xbf16> to vector<8x8xbf16>
      %159 = vector.shape_cast %156 : vector<8x8xbf16> to vector<1x8x8xbf16>
      tpu.vector_store %arg21[%c2_79, %c0_80, %c0_81], %159 {strides = array<i32>} : memref<4x8x8xbf16, #tpu.memory_space<vmem>>, vector<1x8x8xbf16>,
      %160 = vector.extract_strided_slice %124 {offsets = [0, 24], sizes = [8, 8], strides = [1, 1]} : vector<8x32xf32> to vector<8x8xf32>
      %161 = arith.truncf %160 : vector<8x8xf32> to vector<8x8xbf16>
      %c3 = arith.constant 3 : index
      %c0_82 = arith.constant 0 : index
      %c0_83 = arith.constant 0 : index
      %162 = vector.load %arg20[%c3, %c0_82, %c0_83] : memref<4x8x8xbf16, #tpu.memory_space<vmem>>, vector<1x8x8xbf16>
      %163 = vector.shape_cast %162 : vector<1x8x8xbf16> to vector<8x8xbf16>
      %164 = vector.shape_cast %161 : vector<8x8xbf16> to vector<1x8x8xbf16>
      tpu.vector_store %arg20[%c3, %c0_82, %c0_83], %164 {strides = array<i32>} : memref<4x8x8xbf16, #tpu.memory_space<vmem>>, vector<1x8x8xbf16>,
      %165 = vector.extract_strided_slice %129 {offsets = [0, 24], sizes = [8, 8], strides = [1, 1]} : vector<8x32xf32> to vector<8x8xf32>
      %166 = arith.truncf %165 : vector<8x8xf32> to vector<8x8xbf16>
      %c3_84 = arith.constant 3 : index
      %c0_85 = arith.constant 0 : index
      %c0_86 = arith.constant 0 : index
      %167 = vector.load %arg21[%c3_84, %c0_85, %c0_86] : memref<4x8x8xbf16, #tpu.memory_space<vmem>>, vector<1x8x8xbf16>
      %168 = vector.shape_cast %167 : vector<1x8x8xbf16> to vector<8x8xbf16>
      %169 = vector.shape_cast %166 : vector<8x8xbf16> to vector<1x8x8xbf16>
      tpu.vector_store %arg21[%c3_84, %c0_85, %c0_86], %169 {strides = array<i32>} : memref<4x8x8xbf16, #tpu.memory_space<vmem>>, vector<1x8x8xbf16>,
    } else {
    }
    %c8_i32 = arith.constant 8 : i32
    %3 = arith.muli %arg1, %c8_i32 : i32
    %4 = tpu.assume_multiple %3, 8 : i32
    %c0 = arith.constant 0 : index
    %5 = arith.index_cast %4 : i32 to index
    %c0_1 = arith.constant 0 : index
    %6 = vector.load %arg2[%c0, %5, %c0_1] : memref<1x8x32xf32, #tpu.memory_space<vmem>>, vector<1x8x32xf32>
    %7 = vector.shape_cast %6 : vector<1x8x32xf32> to vector<8x32xf32>
    %8 = arith.truncf %7 : vector<8x32xf32> to vector<8x32xbf16>
    %c0_2 = arith.constant 0 : index
    %c0_3 = arith.constant 0 : index
    %9 = vector.load %arg3[%c0_2, %c0_3] : memref<32x32xbf16, #tpu.memory_space<vmem>>, vector<32x32xbf16>
    %cst = arith.constant dense<0.000000e+00> : vector<8x32xf32>
    %10 = tpu.matmul %8, %9, %cst {dimension_numbers = #tpu.dot_dimension_numbers<[1], [0], [0], [1], [0, 0, 1, 1], [], []>} : vector<8x32xbf16>, vector<32x32xbf16>, vector<8x32xf32> -> vector<8x32xf32>
    %c0_4 = arith.constant 0 : index
    %c0_5 = arith.constant 0 : index
    %11 = vector.load %arg4[%c0_4, %c0_5] : memref<1x32xf32, #tpu.memory_space<vmem>>, vector<1x32xf32>
    %12 = vector.broadcast %11 : vector<1x32xf32> to vector<8x32xf32>
    %13 = arith.addf %10, %12 : vector<8x32xf32>
    %14 = vector.extract_strided_slice %13 {offsets = [0, 0], sizes = [8, 8], strides = [1, 1]} : vector<8x32xf32> to vector<8x8xf32>
    %15 = vector.extract_strided_slice %13 {offsets = [0, 8], sizes = [8, 8], strides = [1, 1]} : vector<8x32xf32> to vector<8x8xf32>
    %16 = vector.extract_strided_slice %13 {offsets = [0, 16], sizes = [8, 8], strides = [1, 1]} : vector<8x32xf32> to vector<8x8xf32>
    %17 = vector.extract_strided_slice %13 {offsets = [0, 24], sizes = [8, 8], strides = [1, 1]} : vector<8x32xf32> to vector<8x8xf32>
    %18 = vector.shape_cast %14 : vector<8x8xf32> to vector<1x8x8xf32>
    %19 = vector.shape_cast %15 : vector<8x8xf32> to vector<1x8x8xf32>
    %20 = vector.shape_cast %16 : vector<8x8xf32> to vector<1x8x8xf32>
    %21 = vector.shape_cast %17 : vector<8x8xf32> to vector<1x8x8xf32>
    %22 = tpu.concatenate %18, %19, %20, %21 in 0 : vector<1x8x8xf32>, vector<1x8x8xf32>, vector<1x8x8xf32>, vector<1x8x8xf32> -> vector<4x8x8xf32>
    %23 = arith.truncf %22 : vector<4x8x8xf32> to vector<4x8x8xbf16>
    %c0_6 = arith.constant 0 : index
    %c0_7 = arith.constant 0 : index
    %c0_8 = arith.constant 0 : index
    %24 = vector.load %arg20[%c0_6, %c0_7, %c0_8] : memref<4x8x8xbf16, #tpu.memory_space<vmem>>, vector<4x8x8xbf16>
    "tpu.trace_start"() <{level = 10 : i32, message = "hqd,hkd->hqk"}> : () -> ()
    %cst_9 = arith.constant dense<0.000000e+00> : vector<4x8x8xf32>
    %25 = tpu.matmul %23, %24, %cst_9 {dimension_numbers = #tpu.dot_dimension_numbers<[2], [2], [1], [1], [0, 0, 0, 1, 1, 1], [0], [0]>} : vector<4x8x8xbf16>, vector<4x8x8xbf16>, vector<4x8x8xf32> -> vector<4x8x8xf32>
    "tpu.trace_stop"() : () -> ()
    %cst_10 = arith.constant dense<0xFF800000> : vector<4x8xf32>
    %26 = vector.multi_reduction <maximumf>, %25, %cst_10 [2] : vector<4x8x8xf32> to vector<4x8xf32>
    %27 = vector.shape_cast %26 : vector<4x8xf32> to vector<4x8x1xf32>
    %28 = vector.broadcast %27 : vector<4x8x1xf32> to vector<4x8x8xf32>
    %29 = arith.subf %25, %28 : vector<4x8x8xf32>
    %30 = math.exp %29 : vector<4x8x8xf32>
    %cst_11 = arith.constant dense<0.000000e+00> : vector<4x8xf32>
    %31 = vector.multi_reduction <add>, %30, %cst_11 [2] : vector<4x8x8xf32> to vector<4x8xf32>
    %32 = vector.shape_cast %31 : vector<4x8xf32> to vector<4x8x1xf32>
    %33 = tpu.reciprocal %32 {approx = true} : vector<4x8x1xf32> -> vector<4x8x1xf32>
    %34 = vector.broadcast %33 : vector<4x8x1xf32> to vector<4x8x8xf32>
    %35 = arith.mulf %30, %34 : vector<4x8x8xf32>
    %36 = arith.truncf %35 : vector<4x8x8xf32> to vector<4x8x8xbf16>
    %c0_12 = arith.constant 0 : index
    %c0_13 = arith.constant 0 : index
    %c0_14 = arith.constant 0 : index
    %37 = vector.load %arg21[%c0_12, %c0_13, %c0_14] : memref<4x8x8xbf16, #tpu.memory_space<vmem>>, vector<4x8x8xbf16>
    "tpu.trace_start"() <{level = 10 : i32, message = "hqk,hkd->hqd"}> : () -> ()
    %cst_15 = arith.constant dense<0.000000e+00> : vector<4x8x8xf32>
    %38 = tpu.matmul %36, %37, %cst_15 {dimension_numbers = #tpu.dot_dimension_numbers<[2], [1], [1], [2], [0, 0, 0, 1, 1, 2], [0], [0]>} : vector<4x8x8xbf16>, vector<4x8x8xbf16>, vector<4x8x8xf32> -> vector<4x8x8xf32>
    "tpu.trace_stop"() : () -> ()
    %39 = vector.extract_strided_slice %38 {offsets = [0, 0, 0], sizes = [1, 8, 8], strides = [1, 1, 1]} : vector<4x8x8xf32> to vector<1x8x8xf32>
    %40 = vector.shape_cast %39 : vector<1x8x8xf32> to vector<8x8xf32>
    %41 = vector.extract_strided_slice %38 {offsets = [1, 0, 0], sizes = [1, 8, 8], strides = [1, 1, 1]} : vector<4x8x8xf32> to vector<1x8x8xf32>
    %42 = vector.shape_cast %41 : vector<1x8x8xf32> to vector<8x8xf32>
    %43 = vector.extract_strided_slice %38 {offsets = [2, 0, 0], sizes = [1, 8, 8], strides = [1, 1, 1]} : vector<4x8x8xf32> to vector<1x8x8xf32>
    %44 = vector.shape_cast %43 : vector<1x8x8xf32> to vector<8x8xf32>
    %45 = vector.extract_strided_slice %38 {offsets = [3, 0, 0], sizes = [1, 8, 8], strides = [1, 1, 1]} : vector<4x8x8xf32> to vector<1x8x8xf32>
    %46 = vector.shape_cast %45 : vector<1x8x8xf32> to vector<8x8xf32>
    %47 = tpu.concatenate %40, %42, %44, %46 in 1 : vector<8x8xf32>, vector<8x8xf32>, vector<8x8xf32>, vector<8x8xf32> -> vector<8x32xf32>
    %48 = arith.truncf %47 : vector<8x32xf32> to vector<8x32xbf16>
    %c0_16 = arith.constant 0 : index
    %c0_17 = arith.constant 0 : index
    %49 = vector.load %arg9[%c0_16, %c0_17] : memref<32x32xbf16, #tpu.memory_space<vmem>>, vector<32x32xbf16>
    %cst_18 = arith.constant dense<0.000000e+00> : vector<8x32xf32>
    %50 = tpu.matmul %48, %49, %cst_18 {dimension_numbers = #tpu.dot_dimension_numbers<[1], [0], [0], [1], [0, 0, 1, 1], [], []>} : vector<8x32xbf16>, vector<32x32xbf16>, vector<8x32xf32> -> vector<8x32xf32>
    %c0_19 = arith.constant 0 : index
    %c0_20 = arith.constant 0 : index
    %51 = vector.load %arg10[%c0_19, %c0_20] : memref<1x32xf32, #tpu.memory_space<vmem>>, vector<1x32xf32>
    %52 = vector.broadcast %51 : vector<1x32xf32> to vector<8x32xf32>
    %53 = arith.addf %50, %52 : vector<8x32xf32>
    %54 = arith.addf %7, %53 : vector<8x32xf32>
    %c0_21 = arith.constant 0 : index
    %c0_22 = arith.constant 0 : index
    %55 = vector.load %arg11[%c0_21, %c0_22] : memref<1x32xf32, #tpu.memory_space<vmem>>, vector<1x32xf32>
    %c0_23 = arith.constant 0 : index
    %c0_24 = arith.constant 0 : index
    %56 = vector.load %arg12[%c0_23, %c0_24] : memref<1x32xf32, #tpu.memory_space<vmem>>, vector<1x32xf32>
    %cst_25 = arith.constant dense<0.000000e+00> : vector<8xf32>
    %57 = vector.multi_reduction <add>, %54, %cst_25 [1] : vector<8x32xf32> to vector<8xf32>
    %58 = vector.shape_cast %57 : vector<8xf32> to vector<8x1xf32>
    %cst_26 = arith.constant 3.200000e+01 : f32
    %59 = vector.broadcast %cst_26 : f32 to vector<8x1xf32>
    %60 = arith.divf %58, %59 : vector<8x1xf32>
    %61 = vector.broadcast %60 : vector<8x1xf32> to vector<8x32xf32>
    %62 = arith.subf %54, %61 : vector<8x32xf32>
    %63 = arith.mulf %62, %62 : vector<8x32xf32>
    %cst_27 = arith.constant dense<0.000000e+00> : vector<8xf32>
    %64 = vector.multi_reduction <add>, %63, %cst_27 [1] : vector<8x32xf32> to vector<8xf32>
    %65 = vector.shape_cast %64 : vector<8xf32> to vector<8x1xf32>
    %cst_28 = arith.constant 3.200000e+01 : f32
    %66 = vector.broadcast %cst_28 : f32 to vector<8x1xf32>
    %67 = arith.divf %65, %66 : vector<8x1xf32>
    %cst_29 = arith.constant 9.99999974E-6 : f32
    %68 = vector.broadcast %cst_29 : f32 to vector<8x1xf32>
    %69 = arith.addf %67, %68 : vector<8x1xf32>
    %70 = math.rsqrt %69 : vector<8x1xf32>
    %71 = vector.broadcast %70 : vector<8x1xf32> to vector<8x32xf32>
    %72 = arith.mulf %62, %71 : vector<8x32xf32>
    %73 = vector.broadcast %55 : vector<1x32xf32> to vector<8x32xf32>
    %74 = arith.mulf %72, %73 : vector<8x32xf32>
    %75 = vector.broadcast %56 : vector<1x32xf32> to vector<8x32xf32>
    %76 = arith.addf %74, %75 : vector<8x32xf32>
    %77 = arith.truncf %76 : vector<8x32xf32> to vector<8x32xbf16>
    %c0_30 = arith.constant 0 : index
    %c0_31 = arith.constant 0 : index
    %78 = vector.load %arg13[%c0_30, %c0_31] : memref<32x64xbf16, #tpu.memory_space<vmem>>, vector<32x64xbf16>
    %cst_32 = arith.constant dense<0.000000e+00> : vector<8x64xf32>
    %79 = tpu.matmul %77, %78, %cst_32 {dimension_numbers = #tpu.dot_dimension_numbers<[1], [0], [0], [1], [0, 0, 1, 1], [], []>} : vector<8x32xbf16>, vector<32x64xbf16>, vector<8x64xf32> -> vector<8x64xf32>
    %c0_33 = arith.constant 0 : index
    %c0_34 = arith.constant 0 : index
    %80 = vector.load %arg14[%c0_33, %c0_34] : memref<1x64xf32, #tpu.memory_space<vmem>>, vector<1x64xf32>
    %81 = vector.broadcast %80 : vector<1x64xf32> to vector<8x64xf32>
    %82 = arith.addf %79, %81 : vector<8x64xf32>
    %cst_35 = arith.constant 0.000000e+00 : f32
    %83 = vector.broadcast %cst_35 : f32 to vector<8x64xf32>
    %84 = arith.maximumf %82, %83 : vector<8x64xf32>
    %85 = arith.truncf %84 : vector<8x64xf32> to vector<8x64xbf16>
    %c0_36 = arith.constant 0 : index
    %c0_37 = arith.constant 0 : index
    %86 = vector.load %arg15[%c0_36, %c0_37] : memref<64x32xbf16, #tpu.memory_space<vmem>>, vector<64x32xbf16>
    %cst_38 = arith.constant dense<0.000000e+00> : vector<8x32xf32>
    %87 = tpu.matmul %85, %86, %cst_38 {dimension_numbers = #tpu.dot_dimension_numbers<[1], [0], [0], [1], [0, 0, 1, 1], [], []>} : vector<8x64xbf16>, vector<64x32xbf16>, vector<8x32xf32> -> vector<8x32xf32>
    %c0_39 = arith.constant 0 : index
    %c0_40 = arith.constant 0 : index
    %88 = vector.load %arg16[%c0_39, %c0_40] : memref<1x32xf32, #tpu.memory_space<vmem>>, vector<1x32xf32>
    %89 = vector.broadcast %88 : vector<1x32xf32> to vector<8x32xf32>
    %90 = arith.addf %87, %89 : vector<8x32xf32>
    %91 = arith.addf %76, %90 : vector<8x32xf32>
    %c0_41 = arith.constant 0 : index
    %c0_42 = arith.constant 0 : index
    %92 = vector.load %arg17[%c0_41, %c0_42] : memref<1x32xf32, #tpu.memory_space<vmem>>, vector<1x32xf32>
    %c0_43 = arith.constant 0 : index
    %c0_44 = arith.constant 0 : index
    %93 = vector.load %arg18[%c0_43, %c0_44] : memref<1x32xf32, #tpu.memory_space<vmem>>, vector<1x32xf32>
    %cst_45 = arith.constant dense<0.000000e+00> : vector<8xf32>
    %94 = vector.multi_reduction <add>, %91, %cst_45 [1] : vector<8x32xf32> to vector<8xf32>
    %95 = vector.shape_cast %94 : vector<8xf32> to vector<8x1xf32>
    %cst_46 = arith.constant 3.200000e+01 : f32
    %96 = vector.broadcast %cst_46 : f32 to vector<8x1xf32>
    %97 = arith.divf %95, %96 : vector<8x1xf32>
    %98 = vector.broadcast %97 : vector<8x1xf32> to vector<8x32xf32>
    %99 = arith.subf %91, %98 : vector<8x32xf32>
    %100 = arith.mulf %99, %99 : vector<8x32xf32>
    %cst_47 = arith.constant dense<0.000000e+00> : vector<8xf32>
    %101 = vector.multi_reduction <add>, %100, %cst_47 [1] : vector<8x32xf32> to vector<8xf32>
    %102 = vector.shape_cast %101 : vector<8xf32> to vector<8x1xf32>
    %cst_48 = arith.constant 3.200000e+01 : f32
    %103 = vector.broadcast %cst_48 : f32 to vector<8x1xf32>
    %104 = arith.divf %102, %103 : vector<8x1xf32>
    %cst_49 = arith.constant 9.99999974E-6 : f32
    %105 = vector.broadcast %cst_49 : f32 to vector<8x1xf32>
    %106 = arith.addf %104, %105 : vector<8x1xf32>
    %107 = math.rsqrt %106 : vector<8x1xf32>
    %108 = vector.broadcast %107 : vector<8x1xf32> to vector<8x32xf32>
    %109 = arith.mulf %99, %108 : vector<8x32xf32>
    %110 = vector.broadcast %92 : vector<1x32xf32> to vector<8x32xf32>
    %111 = arith.mulf %109, %110 : vector<8x32xf32>
    %112 = vector.broadcast %93 : vector<1x32xf32> to vector<8x32xf32>
    %113 = arith.addf %111, %112 : vector<8x32xf32>
    %c0_50 = arith.constant 0 : index
    %c0_51 = arith.constant 0 : index
    %c0_52 = arith.constant 0 : index
    %114 = vector.load %arg19[%c0_50, %c0_51, %c0_52] : memref<1x8x32xf32, #tpu.memory_space<vmem>>, vector<1x8x32xf32>
    %115 = vector.shape_cast %114 : vector<1x8x32xf32> to vector<8x32xf32>
    %116 = vector.shape_cast %113 : vector<8x32xf32> to vector<1x8x32xf32>
    tpu.vector_store %arg19[%c0_50, %c0_51, %c0_52], %116 {strides = array<i32>} : memref<1x8x32xf32, #tpu.memory_space<vmem>>, vector<1x8x32xf32>,
    return
  }
  func.func @transform_0(%arg0: i32, %arg1: i32) -> (i32, i32, i32) {
    %c0_i32 = arith.constant 0 : i32
    %c0_i32_0 = arith.constant 0 : i32
    %c0_i32_1 = arith.constant 0 : i32
    return %arg0, %c0_i32, %c0_i32_0 : i32, i32, i32
  }
  func.func @transform_1(%arg0: i32, %arg1: i32) -> (i32, i32) {
    %c0_i32 = arith.constant 0 : i32
    %c0_i32_0 = arith.constant 0 : i32
    %c0_i32_1 = arith.constant 0 : i32
    return %c0_i32, %c0_i32_0 : i32, i32
  }
  func.func @transform_2(%arg0: i32, %arg1: i32) -> (i32, i32) {
    %c0_i32 = arith.constant 0 : i32
    %c0_i32_0 = arith.constant 0 : i32
    %c0_i32_1 = arith.constant 0 : i32
    return %c0_i32, %c0_i32_0 : i32, i32
  }
  func.func @transform_3(%arg0: i32, %arg1: i32) -> (i32, i32) {
    %c0_i32 = arith.constant 0 : i32
    %c0_i32_0 = arith.constant 0 : i32
    %c0_i32_1 = arith.constant 0 : i32
    return %c0_i32, %c0_i32_0 : i32, i32
  }
  func.func @transform_4(%arg0: i32, %arg1: i32) -> (i32, i32) {
    %c0_i32 = arith.constant 0 : i32
    %c0_i32_0 = arith.constant 0 : i32
    %c0_i32_1 = arith.constant 0 : i32
    return %c0_i32, %c0_i32_0 : i32, i32
  }
  func.func @transform_5(%arg0: i32, %arg1: i32) -> (i32, i32) {
    %c0_i32 = arith.constant 0 : i32
    %c0_i32_0 = arith.constant 0 : i32
    %c0_i32_1 = arith.constant 0 : i32
    return %c0_i32, %c0_i32_0 : i32, i32
  }
  func.func @transform_6(%arg0: i32, %arg1: i32) -> (i32, i32) {
    %c0_i32 = arith.constant 0 : i32
    %c0_i32_0 = arith.constant 0 : i32
    %c0_i32_1 = arith.constant 0 : i32
    return %c0_i32, %c0_i32_0 : i32, i32
  }
  func.func @transform_7(%arg0: i32, %arg1: i32) -> (i32, i32) {
    %c0_i32 = arith.constant 0 : i32
    %c0_i32_0 = arith.constant 0 : i32
    %c0_i32_1 = arith.constant 0 : i32
    return %c0_i32, %c0_i32_0 : i32, i32
  }
  func.func @transform_8(%arg0: i32, %arg1: i32) -> (i32, i32) {
    %c0_i32 = arith.constant 0 : i32
    %c0_i32_0 = arith.constant 0 : i32
    %c0_i32_1 = arith.constant 0 : i32
    return %c0_i32, %c0_i32_0 : i32, i32
  }
  func.func @transform_9(%arg0: i32, %arg1: i32) -> (i32, i32) {
    %c0_i32 = arith.constant 0 : i32
    %c0_i32_0 = arith.constant 0 : i32
    %c0_i32_1 = arith.constant 0 : i32
    return %c0_i32, %c0_i32_0 : i32, i32
  }
  func.func @transform_10(%arg0: i32, %arg1: i32) -> (i32, i32) {
    %c0_i32 = arith.constant 0 : i32
    %c0_i32_0 = arith.constant 0 : i32
    %c0_i32_1 = arith.constant 0 : i32
    return %c0_i32, %c0_i32_0 : i32, i32
  }
  func.func @transform_11(%arg0: i32, %arg1: i32) -> (i32, i32) {
    %c0_i32 = arith.constant 0 : i32
    %c0_i32_0 = arith.constant 0 : i32
    %c0_i32_1 = arith.constant 0 : i32
    return %c0_i32, %c0_i32_0 : i32, i32
  }
  func.func @transform_12(%arg0: i32, %arg1: i32) -> (i32, i32) {
    %c0_i32 = arith.constant 0 : i32
    %c0_i32_0 = arith.constant 0 : i32
    %c0_i32_1 = arith.constant 0 : i32
    return %c0_i32, %c0_i32_0 : i32, i32
  }
  func.func @transform_13(%arg0: i32, %arg1: i32) -> (i32, i32) {
    %c0_i32 = arith.constant 0 : i32
    %c0_i32_0 = arith.constant 0 : i32
    %c0_i32_1 = arith.constant 0 : i32
    return %c0_i32, %c0_i32_0 : i32, i32
  }
  func.func @transform_14(%arg0: i32, %arg1: i32) -> (i32, i32) {
    %c0_i32 = arith.constant 0 : i32
    %c0_i32_0 = arith.constant 0 : i32
    %c0_i32_1 = arith.constant 0 : i32
    return %c0_i32, %c0_i32_0 : i32, i32
  }
  func.func @transform_15(%arg0: i32, %arg1: i32) -> (i32, i32) {
    %c0_i32 = arith.constant 0 : i32
    %c0_i32_0 = arith.constant 0 : i32
    %c0_i32_1 = arith.constant 0 : i32
    return %c0_i32, %c0_i32_0 : i32, i32
  }
  func.func @transform_16(%arg0: i32, %arg1: i32) -> (i32, i32) {
    %c0_i32 = arith.constant 0 : i32
    %c0_i32_0 = arith.constant 0 : i32
    %c0_i32_1 = arith.constant 0 : i32
    return %c0_i32, %c0_i32_0 : i32, i32
  }
  func.func @transform_17(%arg0: i32, %arg1: i32) -> (i32, i32, i32) {
    %c0_i32 = arith.constant 0 : i32
    %c0_i32_0 = arith.constant 0 : i32
    return %arg0, %arg1, %c0_i32 : i32, i32, i32
  }
}

module attributes {stable_mosaic.version = 11 : i64} {
  func.func @transformer_layer_kernel(%arg0: i32, %arg1: i32, %arg2: memref<1x8x32xf32, #tpu.memory_space<vmem>>, %arg3: memref<32x32xbf16, #tpu.memory_space<vmem>>, %arg4: memref<1x32xf32, #tpu.memory_space<vmem>>, %arg5: memref<32x32xbf16, #tpu.memory_space<vmem>>, %arg6: memref<1x32xf32, #tpu.memory_space<vmem>>, %arg7: memref<32x32xbf16, #tpu.memory_space<vmem>>, %arg8: memref<1x32xf32, #tpu.memory_space<vmem>>, %arg9: memref<32x32xbf16, #tpu.memory_space<vmem>>, %arg10: memref<1x32xf32, #tpu.memory_space<vmem>>, %arg11: memref<1x32xf32, #tpu.memory_space<vmem>>, %arg12: memref<1x32xf32, #tpu.memory_space<vmem>>, %arg13: memref<32x64xbf16, #tpu.memory_space<vmem>>, %arg14: memref<1x64xf32, #tpu.memory_space<vmem>>, %arg15: memref<64x32xbf16, #tpu.memory_space<vmem>>, %arg16: memref<1x32xf32, #tpu.memory_space<vmem>>, %arg17: memref<1x32xf32, #tpu.memory_space<vmem>>, %arg18: memref<1x32xf32, #tpu.memory_space<vmem>>, %arg19: memref<1x8x32xf32, #tpu.memory_space<vmem>>, %arg20: memref<4x8x8xbf16, #tpu.memory_space<vmem>>, %arg21: memref<4x8x8xbf16, #tpu.memory_space<vmem>>) attributes {dimension_semantics = [#tpu.dimension_semantics<parallel>, #tpu.dimension_semantics<arbitrary>], iteration_bounds = array<i64: 2, 1>, scalar_prefetch = 0 : i64, scratch_operands = 2 : i64, tpu.core_type = #tpu.core_type<tc>, window_params = [{transform_indices = @transform_0, window_bounds = array<i64: 1, 8, 32>}, {pipeline_mode = #tpu.pipeline_mode<synchronous>, transform_indices = @transform_1, window_bounds = array<i64: 32, 32>}, {pipeline_mode = #tpu.pipeline_mode<synchronous>, transform_indices = @transform_2, window_bounds = array<i64: 1, 32>}, {pipeline_mode = #tpu.pipeline_mode<synchronous>, transform_indices = @transform_3, window_bounds = array<i64: 32, 32>}, {pipeline_mode = #tpu.pipeline_mode<synchronous>, transform_indices = @transform_4, window_bounds = array<i64: 1, 32>}, {pipeline_mode = #tpu.pipeline_mode<synchronous>, transform_indices = @transform_5, window_bounds = array<i64: 32, 32>}, {pipeline_mode = #tpu.pipeline_mode<synchronous>, transform_indices = @transform_6, window_bounds = array<i64: 1, 32>}, {pipeline_mode = #tpu.pipeline_mode<synchronous>, transform_indices = @transform_7, window_bounds = array<i64: 32, 32>}, {pipeline_mode = #tpu.pipeline_mode<synchronous>, transform_indices = @transform_8, window_bounds = array<i64: 1, 32>}, {pipeline_mode = #tpu.pipeline_mode<synchronous>, transform_indices = @transform_9, window_bounds = array<i64: 1, 32>}, {pipeline_mode = #tpu.pipeline_mode<synchronous>, transform_indices = @transform_10, window_bounds = array<i64: 1, 32>}, {pipeline_mode = #tpu.pipeline_mode<synchronous>, transform_indices = @transform_11, window_bounds = array<i64: 32, 64>}, {pipeline_mode = #tpu.pipeline_mode<synchronous>, transform_indices = @transform_12, window_bounds = array<i64: 1, 64>}, {pipeline_mode = #tpu.pipeline_mode<synchronous>, transform_indices = @transform_13, window_bounds = array<i64: 64, 32>}, {pipeline_mode = #tpu.pipeline_mode<synchronous>, transform_indices = @transform_14, window_bounds = array<i64: 1, 32>}, {pipeline_mode = #tpu.pipeline_mode<synchronous>, transform_indices = @transform_15, window_bounds = array<i64: 1, 32>}, {pipeline_mode = #tpu.pipeline_mode<synchronous>, transform_indices = @transform_16, window_bounds = array<i64: 1, 32>}, {transform_indices = @transform_17, window_bounds = array<i64: 1, 8, 32>}]} {
    %c0_i32 = arith.constant 0 : i32
    %0 = arith.cmpi eq, %arg1, %c0_i32 : i32
    %1 = arith.extui %0 : i1 to i32
    %c0_i32_0 = arith.constant 0 : i32
    %2 = arith.cmpi ne, %1, %c0_i32_0 : i32
    scf.if %2 {
      %c0_53 = arith.constant 0 : index
      %c0_54 = arith.constant 0 : index
      %c0_55 = arith.constant 0 : index
      %117 = vector.load %arg2[%c0_53, %c0_54, %c0_55] : memref<1x8x32xf32, #tpu.memory_space<vmem>>, vector<1x8x32xf32>
      %118 = vector.shape_cast %117 : vector<1x8x32xf32> to vector<8x32xf32>
      %119 = arith.truncf %118 : vector<8x32xf32> to vector<8x32xbf16>
      %c0_56 = arith.constant 0 : index
      %c0_57 = arith.constant 0 : index
      %120 = vector.load %arg5[%c0_56, %c0_57] : memref<32x32xbf16, #tpu.memory_space<vmem>>, vector<32x32xbf16>
      %cst_58 = arith.constant dense<0.000000e+00> : vector<8x32xf32>
      %121 = tpu.matmul %119, %120, %cst_58 {dimension_numbers = #tpu.dot_dimension_numbers<[1], [0], [0], [1], [0, 0, 1, 1], [], []>} : vector<8x32xbf16>, vector<32x32xbf16>, vector<8x32xf32> -> vector<8x32xf32>
      %c0_59 = arith.constant 0 : index
      %c0_60 = arith.constant 0 : index
      %122 = vector.load %arg6[%c0_59, %c0_60] : memref<1x32xf32, #tpu.memory_space<vmem>>, vector<1x32xf32>
      %123 = vector.broadcast %122 : vector<1x32xf32> to vector<8x32xf32>
      %124 = arith.addf %121, %123 : vector<8x32xf32>
      %c0_61 = arith.constant 0 : index
      %c0_62 = arith.constant 0 : index
      %125 = vector.load %arg7[%c0_61, %c0_62] : memref<32x32xbf16, #tpu.memory_space<vmem>>, vector<32x32xbf16>
      %cst_63 = arith.constant dense<0.000000e+00> : vector<8x32xf32>
      %126 = tpu.matmul %119, %125, %cst_63 {dimension_numbers = #tpu.dot_dimension_numbers<[1], [0], [0], [1], [0, 0, 1, 1], [], []>} : vector<8x32xbf16>, vector<32x32xbf16>, vector<8x32xf32> -> vector<8x32xf32>
      %c0_64 = arith.constant 0 : index
      %c0_65 = arith.constant 0 : index
      %127 = vector.load %arg8[%c0_64, %c0_65] : memref<1x32xf32, #tpu.memory_space<vmem>>, vector<1x32xf32>
      %128 = vector.broadcast %127 : vector<1x32xf32> to vector<8x32xf32>
      %129 = arith.addf %126, %128 : vector<8x32xf32>
      %130 = vector.extract_strided_slice %124 {offsets = [0, 0], sizes = [8, 8], strides = [1, 1]} : vector<8x32xf32> to vector<8x8xf32>
      %131 = arith.truncf %130 : vector<8x8xf32> to vector<8x8xbf16>
      %c0_66 = arith.constant 0 : index
      %c0_67 = arith.constant 0 : index
      %c0_68 = arith.constant 0 : index
      %132 = vector.load %arg20[%c0_66, %c0_67, %c0_68] : memref<4x8x8xbf16, #tpu.memory_space<vmem>>, vector<1x8x8xbf16>
      %133 = vector.shape_cast %132 : vector<1x8x8xbf16> to vector<8x8xbf16>
      %134 = vector.shape_cast %131 : vector<8x8xbf16> to vector<1x8x8xbf16>
      tpu.vector_store %arg20[%c0_66, %c0_67, %c0_68], %134 {strides = array<i32>} : memref<4x8x8xbf16, #tpu.memory_space<vmem>>, vector<1x8x8xbf16>,
      %135 = vector.extract_strided_slice %129 {offsets = [0, 0], sizes = [8, 8], strides = [1, 1]} : vector<8x32xf32> to vector<8x8xf32>
      %136 = arith.truncf %135 : vector<8x8xf32> to vector<8x8xbf16>
      %c0_69 = arith.constant 0 : index
      %c0_70 = arith.constant 0 : index
      %c0_71 = arith.constant 0 : index
      %137 = vector.load %arg21[%c0_69, %c0_70, %c0_71] : memref<4x8x8xbf16, #tpu.memory_space<vmem>>, vector<1x8x8xbf16>
      %138 = vector.shape_cast %137 : vector<1x8x8xbf16> to vector<8x8xbf16>
      %139 = vector.shape_cast %136 : vector<8x8xbf16> to vector<1x8x8xbf16>
      tpu.vector_store %arg21[%c0_69, %c0_70, %c0_71], %139 {strides = array<i32>} : memref<4x8x8xbf16, #tpu.memory_space<vmem>>, vector<1x8x8xbf16>,
      %140 = vector.extract_strided_slice %124 {offsets = [0, 8], sizes = [8, 8], strides = [1, 1]} : vector<8x32xf32> to vector<8x8xf32>
      %141 = arith.truncf %140 : vector<8x8xf32> to vector<8x8xbf16>
      %c1 = arith.constant 1 : index
      %c0_72 = arith.constant 0 : index
      %c0_73 = arith.constant 0 : index
      %142 = vector.load %arg20[%c1, %c0_72, %c0_73] : memref<4x8x8xbf16, #tpu.memory_space<vmem>>, vector<1x8x8xbf16>
      %143 = vector.shape_cast %142 : vector<1x8x8xbf16> to vector<8x8xbf16>
      %144 = vector.shape_cast %141 : vector<8x8xbf16> to vector<1x8x8xbf16>
      tpu.vector_store %arg20[%c1, %c0_72, %c0_73], %144 {strides = array<i32>} : memref<4x8x8xbf16, #tpu.memory_space<vmem>>, vector<1x8x8xbf16>,
      %145 = vector.extract_strided_slice %129 {offsets = [0, 8], sizes = [8, 8], strides = [1, 1]} : vector<8x32xf32> to vector<8x8xf32>
      %146 = arith.truncf %145 : vector<8x8xf32> to vector<8x8xbf16>
      %c1_74 = arith.constant 1 : index
      %c0_75 = arith.constant 0 : index
      %c0_76 = arith.constant 0 : index
      %147 = vector.load %arg21[%c1_74, %c0_75, %c0_76] : memref<4x8x8xbf16, #tpu.memory_space<vmem>>, vector<1x8x8xbf16>
      %148 = vector.shape_cast %147 : vector<1x8x8xbf16> to vector<8x8xbf16>
      %149 = vector.shape_cast %146 : vector<8x8xbf16> to vector<1x8x8xbf16>
      tpu.vector_store %arg21[%c1_74, %c0_75, %c0_76], %149 {strides = array<i32>} : memref<4x8x8xbf16, #tpu.memory_space<vmem>>, vector<1x8x8xbf16>,
      %150 = vector.extract_strided_slice %124 {offsets = [0, 16], sizes = [8, 8], strides = [1, 1]} : vector<8x32xf32> to vector<8x8xf32>
      %151 = arith.truncf %150 : vector<8x8xf32> to vector<8x8xbf16>
      %c2 = arith.constant 2 : index
      %c0_77 = arith.constant 0 : index
      %c0_78 = arith.constant 0 : index
      %152 = vector.load %arg20[%c2, %c0_77, %c0_78] : memref<4x8x8xbf16, #tpu.memory_space<vmem>>, vector<1x8x8xbf16>
      %153 = vector.shape_cast %152 : vector<1x8x8xbf16> to vector<8x8xbf16>
      %154 = vector.shape_cast %151 : vector<8x8xbf16> to vector<1x8x8xbf16>
      tpu.vector_store %arg20[%c2, %c0_77, %c0_78], %154 {strides = array<i32>} : memref<4x8x8xbf16, #tpu.memory_space<vmem>>, vector<1x8x8xbf16>,
      %155 = vector.extract_strided_slice %129 {offsets = [0, 16], sizes = [8, 8], strides = [1, 1]} : vector<8x32xf32> to vector<8x8xf32>
      %156 = arith.truncf %155 : vector<8x8xf32> to vector<8x8xbf16>
      %c2_79 = arith.constant 2 : index
      %c0_80 = arith.constant 0 : index
      %c0_81 = arith.constant 0 : index
      %157 = vector.load %arg21[%c2_79, %c0_80, %c0_81] : memref<4x8x8xbf16, #tpu.memory_space<vmem>>, vector<1x8x8xbf16>
      %158 = vector.shape_cast %157 : vector<1x8x8xbf16> to vector<8x8xbf16>
      %159 = vector.shape_cast %156 : vector<8x8xbf16> to vector<1x8x8xbf16>
      tpu.vector_store %arg21[%c2_79, %c0_80, %c0_81], %159 {strides = array<i32>} : memref<4x8x8xbf16, #tpu.memory_space<vmem>>, vector<1x8x8xbf16>,
      %160 = vector.extract_strided_slice %124 {offsets = [0, 24], sizes = [8, 8], strides = [1, 1]} : vector<8x32xf32> to vector<8x8xf32>
      %161 = arith.truncf %160 : vector<8x8xf32> to vector<8x8xbf16>
      %c3 = arith.constant 3 : index
      %c0_82 = arith.constant 0 : index
      %c0_83 = arith.constant 0 : index
      %162 = vector.load %arg20[%c3, %c0_82, %c0_83] : memref<4x8x8xbf16, #tpu.memory_space<vmem>>, vector<1x8x8xbf16>
      %163 = vector.shape_cast %162 : vector<1x8x8xbf16> to vector<8x8xbf16>
      %164 = vector.shape_cast %161 : vector<8x8xbf16> to vector<1x8x8xbf16>
      tpu.vector_store %arg20[%c3, %c0_82, %c0_83], %164 {strides = array<i32>} : memref<4x8x8xbf16, #tpu.memory_space<vmem>>, vector<1x8x8xbf16>,
      %165 = vector.extract_strided_slice %129 {offsets = [0, 24], sizes = [8, 8], strides = [1, 1]} : vector<8x32xf32> to vector<8x8xf32>
      %166 = arith.truncf %165 : vector<8x8xf32> to vector<8x8xbf16>
      %c3_84 = arith.constant 3 : index
      %c0_85 = arith.constant 0 : index
      %c0_86 = arith.constant 0 : index
      %167 = vector.load %arg21[%c3_84, %c0_85, %c0_86] : memref<4x8x8xbf16, #tpu.memory_space<vmem>>, vector<1x8x8xbf16>
      %168 = vector.shape_cast %167 : vector<1x8x8xbf16> to vector<8x8xbf16>
      %169 = vector.shape_cast %166 : vector<8x8xbf16> to vector<1x8x8xbf16>
      tpu.vector_store %arg21[%c3_84, %c0_85, %c0_86], %169 {strides = array<i32>} : memref<4x8x8xbf16, #tpu.memory_space<vmem>>, vector<1x8x8xbf16>,
    } else {
    }
    %c8_i32 = arith.constant 8 : i32
    %3 = arith.muli %arg1, %c8_i32 : i32
    %4 = tpu.assume_multiple %3, 8 : i32
    %c0 = arith.constant 0 : index
    %5 = arith.index_cast %4 : i32 to index
    %c0_1 = arith.constant 0 : index
    %6 = vector.load %arg2[%c0, %5, %c0_1] : memref<1x8x32xf32, #tpu.memory_space<vmem>>, vector<1x8x32xf32>
    %7 = vector.shape_cast %6 : vector<1x8x32xf32> to vector<8x32xf32>
    %8 = arith.truncf %7 : vector<8x32xf32> to vector<8x32xbf16>
    %c0_2 = arith.constant 0 : index
    %c0_3 = arith.constant 0 : index
    %9 = vector.load %arg3[%c0_2, %c0_3] : memref<32x32xbf16, #tpu.memory_space<vmem>>, vector<32x32xbf16>
    %cst = arith.constant dense<0.000000e+00> : vector<8x32xf32>
    %10 = tpu.matmul %8, %9, %cst {dimension_numbers = #tpu.dot_dimension_numbers<[1], [0], [0], [1], [0, 0, 1, 1], [], []>} : vector<8x32xbf16>, vector<32x32xbf16>, vector<8x32xf32> -> vector<8x32xf32>
    %c0_4 = arith.constant 0 : index
    %c0_5 = arith.constant 0 : index
    %11 = vector.load %arg4[%c0_4, %c0_5] : memref<1x32xf32, #tpu.memory_space<vmem>>, vector<1x32xf32>
    %12 = vector.broadcast %11 : vector<1x32xf32> to vector<8x32xf32>
    %13 = arith.addf %10, %12 : vector<8x32xf32>
    %14 = vector.extract_strided_slice %13 {offsets = [0, 0], sizes = [8, 8], strides = [1, 1]} : vector<8x32xf32> to vector<8x8xf32>
    %15 = vector.extract_strided_slice %13 {offsets = [0, 8], sizes = [8, 8], strides = [1, 1]} : vector<8x32xf32> to vector<8x8xf32>
    %16 = vector.extract_strided_slice %13 {offsets = [0, 16], sizes = [8, 8], strides = [1, 1]} : vector<8x32xf32> to vector<8x8xf32>
    %17 = vector.extract_strided_slice %13 {offsets = [0, 24], sizes = [8, 8], strides = [1, 1]} : vector<8x32xf32> to vector<8x8xf32>
    %18 = vector.shape_cast %14 : vector<8x8xf32> to vector<1x8x8xf32>
    %19 = vector.shape_cast %15 : vector<8x8xf32> to vector<1x8x8xf32>
    %20 = vector.shape_cast %16 : vector<8x8xf32> to vector<1x8x8xf32>
    %21 = vector.shape_cast %17 : vector<8x8xf32> to vector<1x8x8xf32>
    %22 = tpu.concatenate %18, %19, %20, %21 in 0 : vector<1x8x8xf32>, vector<1x8x8xf32>, vector<1x8x8xf32>, vector<1x8x8xf32> -> vector<4x8x8xf32>
    %23 = arith.truncf %22 : vector<4x8x8xf32> to vector<4x8x8xbf16>
    %c0_6 = arith.constant 0 : index
    %c0_7 = arith.constant 0 : index
    %c0_8 = arith.constant 0 : index
    %24 = vector.load %arg20[%c0_6, %c0_7, %c0_8] : memref<4x8x8xbf16, #tpu.memory_space<vmem>>, vector<4x8x8xbf16>
    "tpu.trace_start"() <{level = 10 : i32, message = "hqd,hkd->hqk"}> : () -> ()
    %cst_9 = arith.constant dense<0.000000e+00> : vector<4x8x8xf32>
    %25 = tpu.matmul %23, %24, %cst_9 {dimension_numbers = #tpu.dot_dimension_numbers<[2], [2], [1], [1], [0, 0, 0, 1, 1, 1], [0], [0]>} : vector<4x8x8xbf16>, vector<4x8x8xbf16>, vector<4x8x8xf32> -> vector<4x8x8xf32>
    "tpu.trace_stop"() : () -> ()
    %cst_10 = arith.constant dense<0xFF800000> : vector<4x8xf32>
    %26 = vector.multi_reduction <maximumf>, %25, %cst_10 [2] : vector<4x8x8xf32> to vector<4x8xf32>
    %27 = vector.shape_cast %26 : vector<4x8xf32> to vector<4x8x1xf32>
    %28 = vector.broadcast %27 : vector<4x8x1xf32> to vector<4x8x8xf32>
    %29 = arith.subf %25, %28 : vector<4x8x8xf32>
    %30 = math.exp %29 : vector<4x8x8xf32>
    %cst_11 = arith.constant dense<0.000000e+00> : vector<4x8xf32>
    %31 = vector.multi_reduction <add>, %30, %cst_11 [2] : vector<4x8x8xf32> to vector<4x8xf32>
    %32 = vector.shape_cast %31 : vector<4x8xf32> to vector<4x8x1xf32>
    %33 = tpu.reciprocal %32 {approx = true} : vector<4x8x1xf32> -> vector<4x8x1xf32>
    %34 = vector.broadcast %33 : vector<4x8x1xf32> to vector<4x8x8xf32>
    %35 = arith.mulf %30, %34 : vector<4x8x8xf32>
    %36 = arith.truncf %35 : vector<4x8x8xf32> to vector<4x8x8xbf16>
    %c0_12 = arith.constant 0 : index
    %c0_13 = arith.constant 0 : index
    %c0_14 = arith.constant 0 : index
    %37 = vector.load %arg21[%c0_12, %c0_13, %c0_14] : memref<4x8x8xbf16, #tpu.memory_space<vmem>>, vector<4x8x8xbf16>
    "tpu.trace_start"() <{level = 10 : i32, message = "hqk,hkd->hqd"}> : () -> ()
    %cst_15 = arith.constant dense<0.000000e+00> : vector<4x8x8xf32>
    %38 = tpu.matmul %36, %37, %cst_15 {dimension_numbers = #tpu.dot_dimension_numbers<[2], [1], [1], [2], [0, 0, 0, 1, 1, 2], [0], [0]>} : vector<4x8x8xbf16>, vector<4x8x8xbf16>, vector<4x8x8xf32> -> vector<4x8x8xf32>
    "tpu.trace_stop"() : () -> ()
    %39 = vector.extract_strided_slice %38 {offsets = [0, 0, 0], sizes = [1, 8, 8], strides = [1, 1, 1]} : vector<4x8x8xf32> to vector<1x8x8xf32>
    %40 = vector.shape_cast %39 : vector<1x8x8xf32> to vector<8x8xf32>
    %41 = vector.extract_strided_slice %38 {offsets = [1, 0, 0], sizes = [1, 8, 8], strides = [1, 1, 1]} : vector<4x8x8xf32> to vector<1x8x8xf32>
    %42 = vector.shape_cast %41 : vector<1x8x8xf32> to vector<8x8xf32>
    %43 = vector.extract_strided_slice %38 {offsets = [2, 0, 0], sizes = [1, 8, 8], strides = [1, 1, 1]} : vector<4x8x8xf32> to vector<1x8x8xf32>
    %44 = vector.shape_cast %43 : vector<1x8x8xf32> to vector<8x8xf32>
    %45 = vector.extract_strided_slice %38 {offsets = [3, 0, 0], sizes = [1, 8, 8], strides = [1, 1, 1]} : vector<4x8x8xf32> to vector<1x8x8xf32>
    %46 = vector.shape_cast %45 : vector<1x8x8xf32> to vector<8x8xf32>
    %47 = tpu.concatenate %40, %42, %44, %46 in 1 : vector<8x8xf32>, vector<8x8xf32>, vector<8x8xf32>, vector<8x8xf32> -> vector<8x32xf32>
    %48 = arith.truncf %47 : vector<8x32xf32> to vector<8x32xbf16>
    %c0_16 = arith.constant 0 : index
    %c0_17 = arith.constant 0 : index
    %49 = vector.load %arg9[%c0_16, %c0_17] : memref<32x32xbf16, #tpu.memory_space<vmem>>, vector<32x32xbf16>
    %cst_18 = arith.constant dense<0.000000e+00> : vector<8x32xf32>
    %50 = tpu.matmul %48, %49, %cst_18 {dimension_numbers = #tpu.dot_dimension_numbers<[1], [0], [0], [1], [0, 0, 1, 1], [], []>} : vector<8x32xbf16>, vector<32x32xbf16>, vector<8x32xf32> -> vector<8x32xf32>
    %c0_19 = arith.constant 0 : index
    %c0_20 = arith.constant 0 : index
    %51 = vector.load %arg10[%c0_19, %c0_20] : memref<1x32xf32, #tpu.memory_space<vmem>>, vector<1x32xf32>
    %52 = vector.broadcast %51 : vector<1x32xf32> to vector<8x32xf32>
    %53 = arith.addf %50, %52 : vector<8x32xf32>
    %54 = arith.addf %7, %53 : vector<8x32xf32>
    %c0_21 = arith.constant 0 : index
    %c0_22 = arith.constant 0 : index
    %55 = vector.load %arg11[%c0_21, %c0_22] : memref<1x32xf32, #tpu.memory_space<vmem>>, vector<1x32xf32>
    %c0_23 = arith.constant 0 : index
    %c0_24 = arith.constant 0 : index
    %56 = vector.load %arg12[%c0_23, %c0_24] : memref<1x32xf32, #tpu.memory_space<vmem>>, vector<1x32xf32>
    %cst_25 = arith.constant dense<0.000000e+00> : vector<8xf32>
    %57 = vector.multi_reduction <add>, %54, %cst_25 [1] : vector<8x32xf32> to vector<8xf32>
    %58 = vector.shape_cast %57 : vector<8xf32> to vector<8x1xf32>
    %cst_26 = arith.constant 3.200000e+01 : f32
    %59 = vector.broadcast %cst_26 : f32 to vector<8x1xf32>
    %60 = arith.divf %58, %59 : vector<8x1xf32>
    %61 = vector.broadcast %60 : vector<8x1xf32> to vector<8x32xf32>
    %62 = arith.subf %54, %61 : vector<8x32xf32>
    %63 = arith.mulf %62, %62 : vector<8x32xf32>
    %cst_27 = arith.constant dense<0.000000e+00> : vector<8xf32>
    %64 = vector.multi_reduction <add>, %63, %cst_27 [1] : vector<8x32xf32> to vector<8xf32>
    %65 = vector.shape_cast %64 : vector<8xf32> to vector<8x1xf32>
    %cst_28 = arith.constant 3.200000e+01 : f32
    %66 = vector.broadcast %cst_28 : f32 to vector<8x1xf32>
    %67 = arith.divf %65, %66 : vector<8x1xf32>
    %cst_29 = arith.constant 9.99999974E-6 : f32
    %68 = vector.broadcast %cst_29 : f32 to vector<8x1xf32>
    %69 = arith.addf %67, %68 : vector<8x1xf32>
    %70 = math.rsqrt %69 : vector<8x1xf32>
    %71 = vector.broadcast %70 : vector<8x1xf32> to vector<8x32xf32>
    %72 = arith.mulf %62, %71 : vector<8x32xf32>
    %73 = vector.broadcast %55 : vector<1x32xf32> to vector<8x32xf32>
    %74 = arith.mulf %72, %73 : vector<8x32xf32>
    %75 = vector.broadcast %56 : vector<1x32xf32> to vector<8x32xf32>
    %76 = arith.addf %74, %75 : vector<8x32xf32>
    %77 = arith.truncf %76 : vector<8x32xf32> to vector<8x32xbf16>
    %c0_30 = arith.constant 0 : index
    %c0_31 = arith.constant 0 : index
    %78 = vector.load %arg13[%c0_30, %c0_31] : memref<32x64xbf16, #tpu.memory_space<vmem>>, vector<32x64xbf16>
    %cst_32 = arith.constant dense<0.000000e+00> : vector<8x64xf32>
    %79 = tpu.matmul %77, %78, %cst_32 {dimension_numbers = #tpu.dot_dimension_numbers<[1], [0], [0], [1], [0, 0, 1, 1], [], []>} : vector<8x32xbf16>, vector<32x64xbf16>, vector<8x64xf32> -> vector<8x64xf32>
    %c0_33 = arith.constant 0 : index
    %c0_34 = arith.constant 0 : index
    %80 = vector.load %arg14[%c0_33, %c0_34] : memref<1x64xf32, #tpu.memory_space<vmem>>, vector<1x64xf32>
    %81 = vector.broadcast %80 : vector<1x64xf32> to vector<8x64xf32>
    %82 = arith.addf %79, %81 : vector<8x64xf32>
    %cst_35 = arith.constant 0.000000e+00 : f32
    %83 = vector.broadcast %cst_35 : f32 to vector<8x64xf32>
    %84 = arith.maximumf %82, %83 : vector<8x64xf32>
    %85 = arith.truncf %84 : vector<8x64xf32> to vector<8x64xbf16>
    %c0_36 = arith.constant 0 : index
    %c0_37 = arith.constant 0 : index
    %86 = vector.load %arg15[%c0_36, %c0_37] : memref<64x32xbf16, #tpu.memory_space<vmem>>, vector<64x32xbf16>
    %cst_38 = arith.constant dense<0.000000e+00> : vector<8x32xf32>
    %87 = tpu.matmul %85, %86, %cst_38 {dimension_numbers = #tpu.dot_dimension_numbers<[1], [0], [0], [1], [0, 0, 1, 1], [], []>} : vector<8x64xbf16>, vector<64x32xbf16>, vector<8x32xf32> -> vector<8x32xf32>
    %c0_39 = arith.constant 0 : index
    %c0_40 = arith.constant 0 : index
    %88 = vector.load %arg16[%c0_39, %c0_40] : memref<1x32xf32, #tpu.memory_space<vmem>>, vector<1x32xf32>
    %89 = vector.broadcast %88 : vector<1x32xf32> to vector<8x32xf32>
    %90 = arith.addf %87, %89 : vector<8x32xf32>
    %91 = arith.addf %76, %90 : vector<8x32xf32>
    %c0_41 = arith.constant 0 : index
    %c0_42 = arith.constant 0 : index
    %92 = vector.load %arg17[%c0_41, %c0_42] : memref<1x32xf32, #tpu.memory_space<vmem>>, vector<1x32xf32>
    %c0_43 = arith.constant 0 : index
    %c0_44 = arith.constant 0 : index
    %93 = vector.load %arg18[%c0_43, %c0_44] : memref<1x32xf32, #tpu.memory_space<vmem>>, vector<1x32xf32>
    %cst_45 = arith.constant dense<0.000000e+00> : vector<8xf32>
    %94 = vector.multi_reduction <add>, %91, %cst_45 [1] : vector<8x32xf32> to vector<8xf32>
    %95 = vector.shape_cast %94 : vector<8xf32> to vector<8x1xf32>
    %cst_46 = arith.constant 3.200000e+01 : f32
    %96 = vector.broadcast %cst_46 : f32 to vector<8x1xf32>
    %97 = arith.divf %95, %96 : vector<8x1xf32>
    %98 = vector.broadcast %97 : vector<8x1xf32> to vector<8x32xf32>
    %99 = arith.subf %91, %98 : vector<8x32xf32>
    %100 = arith.mulf %99, %99 : vector<8x32xf32>
    %cst_47 = arith.constant dense<0.000000e+00> : vector<8xf32>
    %101 = vector.multi_reduction <add>, %100, %cst_47 [1] : vector<8x32xf32> to vector<8xf32>
    %102 = vector.shape_cast %101 : vector<8xf32> to vector<8x1xf32>
    %cst_48 = arith.constant 3.200000e+01 : f32
    %103 = vector.broadcast %cst_48 : f32 to vector<8x1xf32>
    %104 = arith.divf %102, %103 : vector<8x1xf32>
    %cst_49 = arith.constant 9.99999974E-6 : f32
    %105 = vector.broadcast %cst_49 : f32 to vector<8x1xf32>
    %106 = arith.addf %104, %105 : vector<8x1xf32>
    %107 = math.rsqrt %106 : vector<8x1xf32>
    %108 = vector.broadcast %107 : vector<8x1xf32> to vector<8x32xf32>
    %109 = arith.mulf %99, %108 : vector<8x32xf32>
    %110 = vector.broadcast %92 : vector<1x32xf32> to vector<8x32xf32>
    %111 = arith.mulf %109, %110 : vector<8x32xf32>
    %112 = vector.broadcast %93 : vector<1x32xf32> to vector<8x32xf32>
    %113 = arith.addf %111, %112 : vector<8x32xf32>
    %c0_50 = arith.constant 0 : index
    %c0_51 = arith.constant 0 : index
    %c0_52 = arith.constant 0 : index
    %114 = vector.load %arg19[%c0_50, %c0_51, %c0_52] : memref<1x8x32xf32, #tpu.memory_space<vmem>>, vector<1x8x32xf32>
    %115 = vector.shape_cast %114 : vector<1x8x32xf32> to vector<8x32xf32>
    %116 = vector.shape_cast %113 : vector<8x32xf32> to vector<1x8x32xf32>
    tpu.vector_store %arg19[%c0_50, %c0_51, %c0_52], %116 {strides = array<i32>} : memref<1x8x32xf32, #tpu.memory_space<vmem>>, vector<1x8x32xf32>,
    return
  }
  func.func @transform_0(%arg0: i32, %arg1: i32) -> (i32, i32, i32) {
    %c0_i32 = arith.constant 0 : i32
    %c0_i32_0 = arith.constant 0 : i32
    %c0_i32_1 = arith.constant 0 : i32
    return %arg0, %c0_i32, %c0_i32_0 : i32, i32, i32
  }
  func.func @transform_1(%arg0: i32, %arg1: i32) -> (i32, i32) {
    %c0_i32 = arith.constant 0 : i32
    %c0_i32_0 = arith.constant 0 : i32
    %c0_i32_1 = arith.constant 0 : i32
    return %c0_i32, %c0_i32_0 : i32, i32
  }
  func.func @transform_2(%arg0: i32, %arg1: i32) -> (i32, i32) {
    %c0_i32 = arith.constant 0 : i32
    %c0_i32_0 = arith.constant 0 : i32
    %c0_i32_1 = arith.constant 0 : i32
    return %c0_i32, %c0_i32_0 : i32, i32
  }
  func.func @transform_3(%arg0: i32, %arg1: i32) -> (i32, i32) {
    %c0_i32 = arith.constant 0 : i32
    %c0_i32_0 = arith.constant 0 : i32
    %c0_i32_1 = arith.constant 0 : i32
    return %c0_i32, %c0_i32_0 : i32, i32
  }
  func.func @transform_4(%arg0: i32, %arg1: i32) -> (i32, i32) {
    %c0_i32 = arith.constant 0 : i32
    %c0_i32_0 = arith.constant 0 : i32
    %c0_i32_1 = arith.constant 0 : i32
    return %c0_i32, %c0_i32_0 : i32, i32
  }
  func.func @transform_5(%arg0: i32, %arg1: i32) -> (i32, i32) {
    %c0_i32 = arith.constant 0 : i32
    %c0_i32_0 = arith.constant 0 : i32
    %c0_i32_1 = arith.constant 0 : i32
    return %c0_i32, %c0_i32_0 : i32, i32
  }
  func.func @transform_6(%arg0: i32, %arg1: i32) -> (i32, i32) {
    %c0_i32 = arith.constant 0 : i32
    %c0_i32_0 = arith.constant 0 : i32
    %c0_i32_1 = arith.constant 0 : i32
    return %c0_i32, %c0_i32_0 : i32, i32
  }
  func.func @transform_7(%arg0: i32, %arg1: i32) -> (i32, i32) {
    %c0_i32 = arith.constant 0 : i32
    %c0_i32_0 = arith.constant 0 : i32
    %c0_i32_1 = arith.constant 0 : i32
    return %c0_i32, %c0_i32_0 : i32, i32
  }
  func.func @transform_8(%arg0: i32, %arg1: i32) -> (i32, i32) {
    %c0_i32 = arith.constant 0 : i32
    %c0_i32_0 = arith.constant 0 : i32
    %c0_i32_1 = arith.constant 0 : i32
    return %c0_i32, %c0_i32_0 : i32, i32
  }
  func.func @transform_9(%arg0: i32, %arg1: i32) -> (i32, i32) {
    %c0_i32 = arith.constant 0 : i32
    %c0_i32_0 = arith.constant 0 : i32
    %c0_i32_1 = arith.constant 0 : i32
    return %c0_i32, %c0_i32_0 : i32, i32
  }
  func.func @transform_10(%arg0: i32, %arg1: i32) -> (i32, i32) {
    %c0_i32 = arith.constant 0 : i32
    %c0_i32_0 = arith.constant 0 : i32
    %c0_i32_1 = arith.constant 0 : i32
    return %c0_i32, %c0_i32_0 : i32, i32
  }
  func.func @transform_11(%arg0: i32, %arg1: i32) -> (i32, i32) {
    %c0_i32 = arith.constant 0 : i32
    %c0_i32_0 = arith.constant 0 : i32
    %c0_i32_1 = arith.constant 0 : i32
    return %c0_i32, %c0_i32_0 : i32, i32
  }
  func.func @transform_12(%arg0: i32, %arg1: i32) -> (i32, i32) {
    %c0_i32 = arith.constant 0 : i32
    %c0_i32_0 = arith.constant 0 : i32
    %c0_i32_1 = arith.constant 0 : i32
    return %c0_i32, %c0_i32_0 : i32, i32
  }
  func.func @transform_13(%arg0: i32, %arg1: i32) -> (i32, i32) {
    %c0_i32 = arith.constant 0 : i32
    %c0_i32_0 = arith.constant 0 : i32
    %c0_i32_1 = arith.constant 0 : i32
    return %c0_i32, %c0_i32_0 : i32, i32
  }
  func.func @transform_14(%arg0: i32, %arg1: i32) -> (i32, i32) {
    %c0_i32 = arith.constant 0 : i32
    %c0_i32_0 = arith.constant 0 : i32
    %c0_i32_1 = arith.constant 0 : i32
    return %c0_i32, %c0_i32_0 : i32, i32
  }
  func.func @transform_15(%arg0: i32, %arg1: i32) -> (i32, i32) {
    %c0_i32 = arith.constant 0 : i32
    %c0_i32_0 = arith.constant 0 : i32
    %c0_i32_1 = arith.constant 0 : i32
    return %c0_i32, %c0_i32_0 : i32, i32
  }
  func.func @transform_16(%arg0: i32, %arg1: i32) -> (i32, i32) {
    %c0_i32 = arith.constant 0 : i32
    %c0_i32_0 = arith.constant 0 : i32
    %c0_i32_1 = arith.constant 0 : i32
    return %c0_i32, %c0_i32_0 : i32, i32
  }
  func.func @transform_17(%arg0: i32, %arg1: i32) -> (i32, i32, i32) {
    %c0_i32 = arith.constant 0 : i32
    %c0_i32_0 = arith.constant 0 : i32
    return %arg0, %arg1, %c0_i32 : i32, i32, i32
  }
}

</mosaic_0001>

<bundles_post_ra>
// kernel: tpu_custom_call.1
= control target key start
LH: loop header
LB: loop body
LE: loop exit
PB: predicated region body
PF: predicated region fallthrough
CT: control target
= control target key end

     0   :  { %s2082_s0 = inlined_call_operand.vmem [shape: f32[2,8,32], index: 0, kind: input, shape index: {}]   ;;  %s2083_s1 = inlined_call_operand.vmem [shape: bf16[32,32], index: 1, kind: input, shape index: {}]   ;;  %s2084_s2 = inlined_call_operand.vmem [shape: f32[1,32], index: 2, kind: input, shape index: {}]   ;;  %s2085_s3 = inlined_call_operand.vmem [shape: bf16[32,32], index: 3, kind: input, shape index: {}]   ;;  %s2086_s4 = inlined_call_operand.vmem [shape: f32[1,32], index: 4, kind: input, shape index: {}]   ;;  %s2087_s5 = inlined_call_operand.hbm [shape: bf16[32,32], index: 5, kind: input, shape index: {}]   ;;  %s2088_s6 = inlined_call_operand.vmem [shape: f32[1,32], index: 6, kind: input, shape index: {}]   ;;  %s2089_s7 = inlined_call_operand.hbm [shape: bf16[32,32], index: 7, kind: input, shape index: {}]   ;;  %s2090_s8 = inlined_call_operand.vmem [shape: f32[1,32], index: 8, kind: input, shape index: {}]   ;;  %s2091_s9 = inlined_call_operand.vmem [shape: f32[1,32], index: 9, kind: input, shape index: {}]   ;;  %s2092_s10 = inlined_call_operand.vmem [shape: f32[1,32], index: 10, kind: input, shape index: {}]   ;;  %s2093_s11 = inlined_call_operand.hbm [shape: bf16[32,64], index: 11, kind: input, shape index: {}]   ;;  %s2094_s12 = inlined_call_operand.vmem [shape: f32[1,64], index: 12, kind: input, shape index: {}]   ;;  %s2095_s13 = inlined_call_operand.vmem [shape: bf16[64,32], index: 13, kind: input, shape index: {}]   ;;  %s2096_s14 = inlined_call_operand.vmem [shape: f32[1,32], index: 14, kind: input, shape index: {}]   ;;  %s2097_s15 = inlined_call_operand.vmem [shape: f32[1,32], index: 15, kind: input, shape index: {}]   ;;  %s2098_s16 = inlined_call_operand.vmem [shape: f32[1,32], index: 16, kind: input, shape index: {}]   ;;  %s2099_s17 = inlined_call_operand.hbm [shape: f32[2,8,32], index: 17, kind: output, shape index: {}]  }
   0x1   :  { %2111 = sst [smem:[#allocation22_spill]] %s2082_s0 }
   0x2   :  { %2112 = sst [smem:[#allocation23_spill]] %s2083_s1 }
   0x3   :  { %2113 = sst [smem:[#allocation24_spill]] %s2084_s2 }
   0x4   :  { %2114 = sst [smem:[#allocation25_spill]] %s2089_s7 }
   0x5   :  { %2115 = sst [smem:[#allocation26_spill]] %s2097_s15 }
   0x6   :  { %2116 = sst [smem:[#allocation27_spill]] %s2098_s16 }
   0x7   :  { %2117 = sst [smem:[#allocation28_spill]] %s2099_s17 }
   0x8   :  { %22 = vsyncpa [#allocation5], 0 }
   0x9   :  { %23 = vsyncpa [#allocation8], 0 }
   0xa   :  { %24 = vsyncpa [#allocation6], 0 }
   0xb   :  { %26 = vsyncpa [#allocation6 + $0x1], 0  ;;  %s1833_s24 = smov 0   ;;  %s1835_s25 = smov 0  }
   0xc   :  { %s1837_s26 = smov 0   ;;  %s1839_s27 = smov 0  }
   0xd   :  { %s1841_s28 = smov 0   ;;  %s1843_s29 = smov 0  }
   0xe LB: > { %2118 = sst [smem:[#allocation14_spill]] %s1709_s24  ;;  %s1325_s0 = sadd.s32 4294967295, %s1729_s29   ;;  %s1729_s29 = sphi %s1843_s29, %s32_s29   ;;  %s1725_s28 = sphi %s1841_s28, %s2146_s28   ;;  %s1721_s27 = sphi %s1839_s27, %s2145_s27   ;;  %s1717_s26 = sphi %s1837_s26, %s2144_s26   ;;  %s1713_s25 = sphi %s1835_s25, %s2148_s25   ;;  %s1709_s24 = sphi %s1833_s24, %s2147_s24  }
   0xf   : > { %2119 = sst [smem:[#allocation15_spill]] %s1717_s26  ;;  %s1326_s30 = sadd.s32 4294967294, %s1729_s29  }
  0x10   : > { %2120 = sst [smem:[#allocation16_spill]] %s1725_s28  ;;  %s44_s18 = sadd.s32 1, %s1725_s28 }
  0x11   : > { %2121 = sst [smem:[#allocation17_spill]] %s1729_s29  ;;  %s415_s19 = sadd.s32 1, %s1717_s26 }
  0x12   : > { %p46_p0 = scmp.ge.s32.totalorder %s44_s18, 2  ;;  %p425_p1 = scmp.ne.s32.totalorder %s1717_s26, %s1713_s25 }
  0x13   : > { %p426_p2 = scmp.eq.s32.totalorder %s1325_s0, 1  ;;  %p431_p3 = scmp.ne.s32.totalorder %s1713_s25, %s1709_s24 }
  0x14   : > { %s2150_s18 = smov (%p46_p0, %s44_s18), 0  ;;  %p432_p5 = scmp.eq.s32.totalorder %s1326_s30, 1 }
  0x15   : > { %2122 = sst [smem:[#allocation18_spill]] %s2150_s18  ;;  %p1873_p4 = por %p426_p2, %p425_p1 }
  0x16   : > { %s410_s20 = ssub.s32 %s1725_s28, %s2150_s18  ;;  %p1327_p6 = scmp.ge.s32.totalorder %s1729_s29, 1 }
  0x17   : > { %s2123_s1 = scalar_select %p1873_p4, 1, 0 }
  0x18   : > { %p413_p7 = scmp.eq.s32.totalorder %s410_s20, 0  ;;  %p1880_p8 = por %p432_p5, %p431_p3 }
  0x19   : > { %2124 = sst [smem:[#allocation19_spill]] %s2123_s1  ;;  %p439_p9 = scmp.lt.s32.totalorder %s1729_s29, 3 }
  0x1a   : > { %s2125_s21 = scalar_select %p1880_p8, 1, 0 }
  0x1b   : > { %s1886_s22 = scalar_select %p413_p7, %s1717_s26, %s415_s19  }
  0x1c   : > { %2126 = sst [smem:[#allocation20_spill]] %s2125_s21  ;;  %p1888_p10 = pnand %p1327_p6, %p439_p9 }
  0x1d   : > { %2127 = sst [smem:[#allocation21_spill]] %s1886_s22  ;;  %p1892_p11 = scmp.eq.s32.totalorder %s1325_s0, 0 }
  0x1e   : > { %p1440_p12 = pneg %p1888_p10  ;;  %s2130_s7 = sld [smem:[#allocation25_spill]] }
  0x1f   : > { %s1731_s28 = smov [#allocation7]   ;;  %s1732_s22 = smov 64  }
  0x20   : > { %p1903_p13 = pnand %p1892_p11, %p1440_p12  ;;  %s481_s0 = sshll.u32 %s1731_s28, 4  ;;  %s482_s0 = int_to_ptr.vmem [resolvable:$true] %s481_s0 }
  0x21   : > { %s1733_s26 = smov 4   ;;  %s462_s30 = sshll.u32 %s2087_s5, 4  ;;  %s463_s30 = int_to_ptr.hbm [resolvable:$true] %s462_s30 }
  0x22   : > { %s1734_s20 = smov [#allocation4]   ;;  %s502_s17 = sshll.u32 %s2093_s11, 4  ;;  %s503_s17 = int_to_ptr.hbm [resolvable:$true] %s502_s17 }
  0x23   : > { %s1735_s28 = smov [#allocation9]  }
  0x24   : > { %s479_s18 = sshll.u32 %s2130_s7, 4  ;;  %s464_s7 = sshll.u32 %s1734_s20, 4  ;;  %s480_s18 = int_to_ptr.hbm [resolvable:$true] %s479_s18  ;;  %s465_s7 = int_to_ptr.vmem [resolvable:$true] %s464_s7 }
  0x25   : > { %1446 = dma.hbm_to_vmem [thread:$0]  (!%p1903_p13), %s480_s18, 256, %s482_s0, [#allocation8], %s1732_s22, %s1732_s22, %s1733_s26  }
  0x26   : > { %1443 = dma.hbm_to_vmem [thread:$0]  (!%p1903_p13), %s463_s30, 256, %s465_s7, [#allocation5], %s1732_s22, %s1732_s22, %s1733_s26  }
  0x27   : > { %s504_s15 = sshll.u32 %s1735_s28, 4  ;;  %542 = sbr.rel (%p1888_p10) target bundleno = 1932 (0x78c), region = 88  ;;  %s505_s15 = int_to_ptr.vmem [resolvable:$true] %s504_s15 }
  0x28   : > { %1449 = dma.hbm_to_vmem [thread:$0]  (!%p1903_p13), %s503_s17, 256, %s505_s15, [#allocation8], %s1732_s22, %s1732_s22, %s1733_s26  }
  0x2c   : > { %1696 = dma.done.wait (%p1892_p11), [#allocation5], 256  }
  0x2d   : > { %1698 = vsyncadd (%p1892_p11), [#allocation5], 4294967040 }
  0x2e   : > { %1700 = dma.done.wait (%p1892_p11), [#allocation8], 512  }
  0x2f   : > { %1702 = vsyncadd (%p1892_p11), [#allocation8], 4294966784  ;;  %p604_p0 = scmp.lt.s32.totalorder %s1721_s27, 1  ;;  %s2132_s26 = sld [smem:[#allocation22_spill]]  ;;  %v1413_v0 = vld [vmem:[%s2085_s3 + $0x8] sm:$0xff]  ;;  %v1412_v1 = vld [vmem:[%s2085_s3] sm:$0xff] }
  0x30   : > { %s2133_s19 = sld [smem:[#allocation23_spill]]  ;;  %645 = vmatpush.bf16.msra.mxu0 %v1413_v0  ;;  %vm635_vm0 = vcmask 261120   ;;  %v1521_v6 = vld [vmem:[%s2086_s4] ss:$0 sm:$0xff]  ;;  %vm686_vm1 = vcmask 60416   ;;  %s1736_s16 = smov 112  }
  0x31   : > { %s605_s7 = scalar_select %p604_p0, %s1721_s27, 1  ;;  %vm781_vm2 = vcmask 64512   ;;  %v1415_v18 = vld [vmem:[#allocation4 + $0x8] sm:$0xff]  ;;  %v1414_v19 = vld [vmem:[#allocation4] sm:$0xff]  ;;  %vm913_vm3 = vcmask 1043456   ;;  %vm1000_vm4 = vcmask 130048  }
  0x32   : > { %s2134_s2 = sld [smem:[#allocation24_spill]]  ;;  %s1737_s17 = smov 104   ;;  %678 = vmatpush.bf16.msra.mxu1 %v1415_v18  ;;  %v1523_v37 = vld [vmem:[%s2088_s6] ss:$0 sm:$0xff]  ;;  %vm1002_vm5 = vcmask 195584   ;;  %vm1156_vm10 = vcmask 523264  }
  0x33   : > { %s1337_s15 = sshll.u32 %s605_s7, 3  ;;  %s1739_s1 = smov 8  }
  0x34   : > { %646 = vmatpush.bf16.msra.mxu0 %v1412_v1  ;;  %s1740_s21 = smov 16   ;;  %s1741_s22 = smov 24  }
  0x35   : > { %s607_s29 = scalar_lea.vmem %s2132_s26, %s1337_s15  ;;  %s1738_s26 = smov 120  }
  0x36   : > { %v1940_v2 = vld [vmem:[%s607_s29] sm:$0xff]  ;;  %v1417_v3 = vld [vmem:[%s2133_s19 + $0x8] sm:$0xff]  ;;  %679 = vmatpush.bf16.msra.mxu1 %v1414_v19  ;;  %s601_s0 = sand.u32 1, %s1713_s25   ;;  %s1409_s20 = sshll.u32 %s1721_s27, 3 }
  0x37   : > { %v1416_v4 = vld [vmem:[%s2133_s19] sm:$0xff]  ;;  %756 = vmatpush.bf16.msra.mxu2 %v1417_v3  ;;  %v614_v5 = vpack.c.bf16 %v1940_v2, %v1940_v2  ;;  %s1336_s30 = sshll.u32 %s601_s0, 3  ;;  %s2135_s15 = sld [smem:[#allocation26_spill]] }
  0x38   : > { %v1522_v10 = vld [vmem:[%s2134_s2] ss:$0 sm:$0xff]  ;;  %s2139_s24 = sld [smem:[#allocation27_spill]]  ;;  %s603_s23 = scalar_lea.vmem [#allocation10], %s1336_s30 }
  0x39   : > { %1346 = vmatmul.msk.bf16.vlgmr.msra.gmra.mxu0 %vm635_vm0, %v614_v5  ;;  %1355 = vmatmul.msk.bf16.vlgmr.msra.gmra.mxu1 %vm635_vm0, %v614_v5  ;;  %s1221_s27 = sshll.u32 %s603_s23, 4  ;;  %s1208_s28 = scalar_lea.sflag [#allocation6], %s601_s0  ;;  %s1222_s27 = int_to_ptr.vmem [resolvable:$true] %s1221_s27 }
  0x3b   : > { %757 = vmatpush.bf16.msra.mxu2 %v1416_v4 }
  0x3e   : > { %1364 = vmatmul.msk.bf16.vlgmr.msra.gmra.mxu2 %vm635_vm0, %v614_v5 }
  0xb6   : > { %v648_v7 = vpop.f32.mrf.mxu0  ;;  %v681_v38 = vpop.f32.mrf.mxu1 }
  0xb7   : > { %v649_v8 = vadd.f32 %v1521_v6, %v648_v7  ;;  %v682_v39 = vadd.f32 %v1523_v37, %v681_v38 }
  0xb9   : > { %v685_v9 = vpack.c.bf16 %v649_v8, %v649_v8  ;;  %v688_v40 = vpack.c.bf16 %v682_v39, %v682_v39 }
  0xbb   : > { %687 = vst.msk [vmem:[#allocation2] sm:$0xf] %vm686_vm1, %v685_v9  ;;  %702 = vrot.lane.b32.xlu1 %v685_v9, %s1736_s16  ;;  %712 = vrot.lane.b32.xlu0 %v685_v9, %s1737_s17 }
  0xbc   : > { %689 = vst.msk [vmem:[#allocation3] sm:$0xf] %vm686_vm1, %v688_v40 }
  0xbe   : > { %v650_v12 = vpop.f32.mrf.mxu0  ;;  %v683_v41 = vpop.f32.mrf.mxu1 }
  0xc1   : > { %v759_v11 = vpop.f32.mrf.mxu2 }
  0xc2   : > { %v760_v13 = vadd.f32 %v1522_v10, %v759_v11  ;;  %v777_v14 = vld [vmem:[#allocation2] sm:$0xf] }
  0xc3   : > { %691 = vrot.lane.b32.xlu0 %v685_v9, %s1738_s26  ;;  %v786_v15 = vsel %vm781_vm2, %v777_v14, 0  ;;  %v906_v44 = vld [vmem:[#allocation3] sm:$0xf] }
  0xc4   : > { %764 = vrot.lane.b32.xlu2 %v760_v13, %s1738_s26  ;;  %770 = vrot.lane.b32.xlu1 %v760_v13, %s1737_s17  ;;  %v773_v17 = vpack.c.bf16 %v760_v13, %v760_v13  ;;  %v915_v45 = vsel %vm913_vm3, %v906_v44, 0  ;;  %v1419_v44 = vld [vmem:[#allocation7 + $0x8] sm:$0xff] }
  0xc5   : > { %795 = vmatpush.bf16.xpose.msra.mxu3 %v786_v15 }
  0xc9   : > { %v761_v16 = vpop.f32.mrf.mxu2 }
  0xcc   : > { %767 = vrot.lane.b32.xlu2 %v760_v13, %s1736_s16  ;;  %1365 = vmatmul.msk.bf16.vlgmr.msra.gmra.mxu3 %vm781_vm2, %v773_v17 }
  0xcd   : > { %924 = vmatpush.bf16.msrb.mxu3 %v915_v45  ;;  %v1418_v45 = vld [vmem:[#allocation7] sm:$0xff] }
  0xd1   : > { %1034 = vmatpush.bf16.msra.mxu3 %v1419_v44 }
  0xd5   : > { %1035 = vmatpush.bf16.msra.mxu3 %v1418_v45 }
 0x11e   : > { %v765_v22 = vpop.permute.xlu2 %764 }
 0x11f   : > { %v774_v34 = vpack.c.bf16 %v765_v22, %v765_v22 }
 0x126   : > { %v768_v29 = vpop.permute.xlu2 %767 }
 0x127   : > { %v775_v31 = vpack.c.bf16 %v768_v29, %v768_v29 }
 0x12d   : > { %v703_v20 = vpop.permute.xlu1 %702  ;;  %v713_v21 = vpop.permute.xlu0 %712 }
 0x12e   : > { %706 = vst.msk [vmem:[#allocation2 + $0x8] sm:$0xf] %vm686_vm1, %v703_v20 }
 0x12f   : > { %716 = vst.msk [vmem:[#allocation2 + $0xc] sm:$0xf] %vm686_vm1, %v713_v21 }
 0x135   : > { %v692_v23 = vpop.permute.xlu0 %691  ;;  %v779_v24 = vld [vmem:[#allocation2 + $0x8] sm:$0xf] }
 0x136   : > { %695 = vst.msk [vmem:[#allocation2 + $0x4] sm:$0xf] %vm686_vm1, %v692_v23  ;;  %v824_v25 = vsel %vm781_vm2, %v779_v24, 0  ;;  %v780_v26 = vld [vmem:[#allocation2 + $0xc] sm:$0xf]  ;;  %v771_v28 = vpop.permute.xlu1 %770 }
 0x137   : > { %833 = vmatpush.bf16.xpose.msrb.mxu1 %v824_v25  ;;  %v843_v27 = vsel %vm781_vm2, %v780_v26, 0  ;;  %v776_v30 = vpack.c.bf16 %v771_v28, %v771_v28 }
 0x138   : > { %852 = vmatpush.bf16.xpose.msrb.mxu2 %v843_v27 }
 0x13d   : > { %v778_v32 = vld [vmem:[#allocation2 + $0x4] sm:$0xf] }
 0x13e   : > { %1367 = vmatmul.msk.bf16.vlgmr.msrb.gmra.mxu1 %vm781_vm2, %v775_v31  ;;  %v805_v33 = vsel %vm781_vm2, %v778_v32, 0 }
 0x13f   : > { %1368 = vmatmul.msk.bf16.vlgmr.msrb.gmra.mxu2 %vm781_vm2, %v776_v30  ;;  %814 = vmatpush.bf16.xpose.msrb.mxu0 %v805_v33 }
 0x146   : > { %1366 = vmatmul.msk.bf16.vlgmr.msrb.gmra.mxu0 %vm781_vm2, %v774_v34 }
 0x14f   : > { %v797_v35 = vpop.f32.mrf.mxu3 }
 0x150   : > { %v858_v51 = vsel %vm781_vm2, %v797_v35, -inf }
 0x157   : > { %v799_v36 = vpop.f32.mrf.mxu3 }
 0x1bb   : > { %v835_v42 = vpop.f32.mrf.mxu1 }
 0x1bc   : > { %v864_v43 = vsel %vm781_vm2, %v835_v42, -inf }
 0x1bd   : > { %865 = vmax.xlane.f32.xlu2 %v864_v43 }
 0x1c2   : > { %v854_v46 = vpop.f32.mrf.mxu2 }
 0x1c3   : > { %v837_v47 = vpop.f32.mrf.mxu1  ;;  %v867_v48 = vsel %vm781_vm2, %v854_v46, -inf  ;;  %v816_v49 = vpop.f32.mrf.mxu0 }
 0x1c4   : > { %868 = vmax.xlane.f32.xlu0 %v867_v48  ;;  %v861_v50 = vsel %vm781_vm2, %v816_v49, -inf }
 0x1c5   : > { %862 = vmax.xlane.f32.xlu1 %v861_v50  ;;  %859 = vmax.xlane.f32.xlu2 %v858_v51 }
 0x1ca   : > { %v856_v52 = vpop.f32.mrf.mxu2 }
 0x1cb   : > { %v818_v53 = vpop.f32.mrf.mxu0 }
 0x1cc   : > { %v1524_v53 = vld [vmem:[%s2090_s8] ss:$0 sm:$0xff] }
 0x1d8   : > { %717 = vrot.lane.b32.xlu0 %v688_v40, %s1737_s17 }
 0x1dd   : > { %697 = vrot.lane.b32.xlu2 %v688_v40, %s1738_s26  ;;  %s2136_s26 = sld [smem:[#allocation28_spill]] }
 0x1e3   : > { %s2137_s18 = smov %s2136_s26  ;;  %s1219_s29 = scalar_lea.hbm %s2136_s26, %s1409_s20 }
 0x1e4   : > { %s1223_s2 = sshll.u32 %s1219_s29, 4  ;;  %s1663_s30 = scalar_lea.hbm %s2137_s18, 16  ;;  %s1224_s2 = int_to_ptr.hbm [resolvable:$true] %s1223_s2 }
 0x1e5   : > { %s1657_s7 = sshra.s32 %s1224_s2, 4  ;;  %s1658_s7 = int_to_ptr.hbm [resolvable:$true] %s1657_s7 }
 0x1e6   : > { %s1659_s20 = scalar_lea.hbm %s1658_s7, 8  ;;  %p1664_p5 = scmp.lt.s32.totalorder %s1658_s7, %s2137_s18 }
 0x1e7   : > { %p1660_p1 = scmp.ne.s32.totalorder %s1658_s7, %s1659_s20  ;;  %p1665_p6 = scmp.lt.s32.totalorder %s1663_s30, %s1659_s20 }
 0x1e9   : > { %p1661_p2 = pnand %p1660_p1, %p1873_p4  ;;  %p1666_p7 = por %p1665_p6, %p1664_p5 }
 0x1eb   : > { %p1662_p3 = pneg %p1661_p2 }
 0x1ed   : > { %p1667_p9 = pnand %p1666_p7, %p1662_p3 }
 0x230   : > { %v866_v54 = vpop.xlane.xlu2 %865 }
 0x231   : > { %v872_v55 = vsub.f32 %v835_v42, %v866_v54 }
 0x233   : > { %v878_v56 = vmul.f32 1.442695, %v872_v55 }
 0x235   : > { %1531 = vpow2.f32 %v878_v56 }
 0x237   : > { %v869_v57 = vpop.xlane.xlu0 %868 }
 0x238   : > { %v863_v58 = vpop.xlane.xlu1 %862  ;;  %v860_v59 = vpop.xlane.xlu2 %859  ;;  %v873_v63 = vsub.f32 %v854_v46, %v869_v57 }
 0x239   : > { %v871_v60 = vsub.f32 %v816_v49, %v863_v58  ;;  %v870_v61 = vsub.f32 %v797_v35, %v860_v59  ;;  %v1742_v59 = vmov 32.0  }
 0x23a   : > { %v880_v4 = vmul.f32 1.442695, %v873_v63 }
 0x23b   : > { %v1532_v62 = vpop.eup %1531  ;;  %v876_v0 = vmul.f32 1.442695, %v871_v60  ;;  %v874_v1 = vmul.f32 1.442695, %v870_v61 }
 0x23c   : > { %v888_v3 = vsel %vm781_vm2, %v1532_v62, 0.0 }
 0x23d   : > { %1533 = vpow2.f32 %v876_v0  ;;  %889 = vadd.xlane.f32.xlu0 %v888_v3 }
 0x23e   : > { %1535 = vpow2.f32 %v874_v1 }
 0x23f   : > { %1537 = vpow2.f32 %v880_v4 }
 0x240   : > { %v698_v5 = vpop.permute.xlu2 %697 }
 0x241   : > { %701 = vst.msk [vmem:[#allocation3 + $0x4] sm:$0xf] %vm686_vm1, %v698_v5 }
 0x243   : > { %v1534_v6 = vpop.eup %1533 }
 0x244   : > { %v1536_v7 = vpop.eup %1535  ;;  %v885_v8 = vsel %vm781_vm2, %v1534_v6, 0.0 }
 0x245   : > { %886 = vadd.xlane.f32.xlu1 %v885_v8  ;;  %v882_v9 = vsel %vm781_vm2, %v1536_v7, 0.0  ;;  %v1538_v11 = vpop.eup %1537  ;;  %v1420_v8 = vld [vmem:[#allocation9] sm:$0xff] }
 0x246   : > { %883 = vadd.xlane.f32.xlu2 %v882_v9  ;;  %v891_v14 = vsel %vm781_vm2, %v1538_v11, 0.0  ;;  %v1425_v9 = vld [vmem:[%s2095_s13 + $0x18] sm:$0xff] }
 0x248   : > { %v907_v10 = vld [vmem:[#allocation3 + $0x4] sm:$0xf] }
 0x249   : > { %v934_v12 = vsel %vm913_vm3, %v907_v10, 0 }
 0x24a   : > { %943 = vmatpush.bf16.msra.mxu0 %v934_v12  ;;  %v718_v13 = vpop.permute.xlu0 %717  ;;  %v1424_v12 = vld [vmem:[%s2095_s13 + $0x10] sm:$0xff] }
 0x24b   : > { %721 = vst.msk [vmem:[#allocation3 + $0xc] sm:$0xf] %vm686_vm1, %v718_v13 }
 0x24d   : > { %892 = vadd.xlane.f32.xlu1 %v891_v14 }
 0x252   : > { %v909_v15 = vld [vmem:[#allocation3 + $0xc] sm:$0xf] }
 0x253   : > { %v972_v16 = vsel %vm913_vm3, %v909_v15, 0 }
 0x254   : > { %981 = vmatpush.bf16.msra.mxu2 %v972_v16 }
 0x266   : > { %707 = vrot.lane.b32.xlu1 %v688_v40, %s1736_s16 }
 0x2b0   : > { %v890_v29 = vpop.xlane.xlu0 %889 }
 0x2b8   : > { %v887_v17 = vpop.xlane.xlu1 %886 }
 0x2b9   : > { %1539 = vrcp.f32 %v887_v17  ;;  %v884_v18 = vpop.xlane.xlu2 %883 }
 0x2ba   : > { %1541 = vrcp.f32 %v884_v18 }
 0x2bf   : > { %v1540_v19 = vpop.eup %1539 }
 0x2c0   : > { %v1542_v20 = vpop.eup %1541  ;;  %v899_v21 = vmul.f32 %v1540_v19, %v1534_v6  ;;  %v893_v22 = vpop.xlane.xlu1 %892 }
 0x2c1   : > { %v898_v23 = vmul.f32 %v1542_v20, %v1536_v7  ;;  %1543 = vrcp.f32 %v893_v22  ;;  %v1525_v20 = vld [vmem:[%s2091_s9] ss:$0 sm:$0xff] }
 0x2c2   : > { %v903_v24 = vpack.c.bf16 %v899_v21, %v899_v21  ;;  %1545 = vrcp.f32 %v890_v29  ;;  %v1526_v22 = vld [vmem:[%s2092_s10] ss:$0 sm:$0xff] }
 0x2c3   : > { %v902_v25 = vpack.c.bf16 %v898_v23, %v898_v23  ;;  %1547 = vrcp.f32 %v1742_v59  ;;  %v1527_v29 = vld [vmem:[%s2094_s12] ss:$0 sm:$0xff] }
 0x2c4   : > { %1370 = vmatmul.msk.bf16.vlgmr.msra.gmra.mxu0 %vm781_vm2, %v903_v24 }
 0x2c5   : > { %1369 = vmatmul.msk.bf16.vlgmr.msrb.gmra.mxu3 %vm781_vm2, %v902_v25 }
 0x2c7   : > { %v1544_v26 = vpop.eup %1543 }
 0x2c8   : > { %v901_v27 = vmul.f32 %v1544_v26, %v1538_v11  ;;  %v1546_v31 = vpop.eup %1545 }
 0x2c9   : > { %v900_v32 = vmul.f32 %v1546_v31, %v1532_v62  ;;  %v1548_v60 = vpop.eup %1547 }
 0x2ca   : > { %v905_v28 = vpack.c.bf16 %v901_v27, %v901_v27  ;;  %v1048_v61 = vmul.f32 32.0, %v1548_v60  ;;  %vm1052_vm6 = vweird.f32 %v1548_v60  ;;  %v1423_v27 = vld [vmem:[%s2095_s13 + $0x8] sm:$0xff] }
 0x2cb   : > { %v904_v35 = vpack.c.bf16 %v900_v32, %v900_v32 }
 0x2cc   : > { %1372 = vmatmul.msk.bf16.vlgmr.msra.gmra.mxu2 %vm781_vm2, %v905_v28  ;;  %v1049_v62 = vsub.f32 1.0, %v1048_v61  ;;  %v1422_v28 = vld [vmem:[%s2095_s13] sm:$0xff] }
 0x2ce   : > { %v1050_v63 = vmul.f32 %v1548_v60, %v1049_v62 }
 0x2d0   : > { %v1051_v0 = vadd.f32 %v1548_v60, %v1050_v63 }
 0x2d2   : > { %v1053_v1 = vsel %vm1052_vm6, %v1548_v60, %v1051_v0 }
 0x2d8   : > { %v708_v30 = vpop.permute.xlu1 %707 }
 0x2d9   : > { %711 = vst.msk [vmem:[#allocation3 + $0x8] sm:$0xf] %vm686_vm1, %v708_v30 }
 0x2e0   : > { %v908_v33 = vld [vmem:[#allocation3 + $0x8] sm:$0xf] }
 0x2e1   : > { %v953_v34 = vsel %vm913_vm3, %v908_v33, 0 }
 0x2e2   : > { %962 = vmatpush.bf16.msra.mxu1 %v953_v34 }
 0x2e5   : > { %1371 = vmatmul.msk.bf16.vlgmr.msra.gmra.mxu1 %vm781_vm2, %v904_v35  ;;  %v1528_v35 = vld [vmem:[%s2096_s14] ss:$0 sm:$0xff] }
 0x2e6   : > { %1164 = vmatpush.bf16.msrb.mxu1 %v1425_v9 }
 0x2ea   : > { %1165 = vmatpush.bf16.msrb.mxu1 %v1424_v12 }
 0x2ee   : > { %1166 = vmatpush.bf16.msrb.mxu1 %v1423_v27 }
 0x2f2   : > { %1167 = vmatpush.bf16.msrb.mxu1 %v1422_v28 }
 0x341   : > { %v945_v36 = vpop.f32.mrf.mxu0 }
 0x342   : > { %988 = vrot.lane.b32.xlu1 %v945_v36, %s1739_s1 }
 0x348   : > { %v926_v37 = vpop.f32.mrf.mxu3 }
 0x349   : > { %v947_v38 = vpop.f32.mrf.mxu0 }
 0x34f   : > { %v983_v39 = vpop.f32.mrf.mxu2 }
 0x350   : > { %v928_v40 = vpop.f32.mrf.mxu3 }
 0x357   : > { %v985_v41 = vpop.f32.mrf.mxu2 }
 0x362   : > { %v964_v42 = vpop.f32.mrf.mxu1 }
 0x363   : > { %992 = vrot.lane.b32.xlu1 %v964_v42, %s1740_s21 }
 0x36a   : > { %v966_v43 = vpop.f32.mrf.mxu1 }
 0x36b   : > { %996 = vrot.lane.b32.xlu1 %v983_v39, %s1741_s22 }
 0x3b4   : > { %v989_v46 = vpop.permute.xlu1 %988 }
 0x3b5   : > { %v999_v48 = vsel %vm781_vm2, %v926_v37, %v989_v46 }
 0x3d5   : > { %v993_v47 = vpop.permute.xlu1 %992 }
 0x3d6   : > { %v1001_v49 = vsel %vm1000_vm4, %v999_v48, %v993_v47 }
 0x3dd   : > { %v997_v50 = vpop.permute.xlu1 %996 }
 0x3de   : > { %v1003_v51 = vsel %vm1002_vm5, %v1001_v49, %v997_v50 }
 0x3df   : > { %v1004_v52 = vpack.c.bf16 %v1003_v51, %v1003_v51 }
 0x3e1   : > { %1381 = vmatmul.msk.bf16.vlgmr.msra.gmra.mxu3 %vm635_vm0, %v1004_v52 }
 0x464   : > { %v1037_v54 = vpop.f32.mrf.mxu3 }
 0x465   : > { %v1038_v55 = vadd.f32 %v1524_v53, %v1037_v54 }
 0x467   : > { %v1041_v56 = vadd.f32 %v1038_v55, %v1940_v2  ;;  %v1421_v2 = vld [vmem:[#allocation9 + $0x8] sm:$0xff]  ;;  %v1529_v55 = vld [vmem:[%s2135_s15] ss:$0 sm:$0xff] }
 0x468   : > { %1111 = vmatpush.bf16.msrb.mxu0 %v1421_v2 }
 0x469   : > { %v1044_v57 = vsel %vm635_vm0, %v1041_v56, 0.0 }
 0x46a   : > { %1045 = vadd.xlane.f32.xlu0 %v1044_v57 }
 0x46c   : > { %v1039_v58 = vpop.f32.mrf.mxu3  ;;  %1112 = vmatpush.bf16.msrb.mxu0 %v1420_v8 }
 0x46d   : > { %v1530_v58 = vld [vmem:[%s2139_s24] ss:$0 sm:$0xff] }
 0x4dd   : > { %v1046_v3 = vpop.xlane.xlu0 %1045 }
 0x4de   : > { %v1054_v4 = vmul.f32 %v1053_v1, %v1046_v3 }
 0x4e0   : > { %v1055_v5 = vsub.f32 %v1041_v56, %v1054_v4 }
 0x4e2   : > { %v1056_v6 = vmul.f32 %v1055_v5, %v1055_v5 }
 0x4e4   : > { %v1057_v7 = vsel %vm635_vm0, %v1056_v6, 0.0 }
 0x4e5   : > { %1058 = vadd.xlane.f32.xlu1 %v1057_v7 }
 0x558   : > { %v1059_v10 = vpop.xlane.xlu1 %1058 }
 0x559   : > { %v1060_v11 = vmul.f32 %v1059_v10, %v1053_v1 }
 0x55b   : > { %v1061_v13 = vadd.f32 1e-05, %v1060_v11 }
 0x55d   : > { %1549 = vrsqrt.f32 %v1061_v13  ;;  %vm1068_vm8 = vweird.f32 %v1061_v13 }
 0x563   : > { %v1550_v14 = vpop.eup %1549 }
 0x564   : > { %v1063_v15 = vmul.f32 %v1550_v14, %v1061_v13  ;;  %vm1069_vm7 = vweird.f32 %v1550_v14 }
 0x565   : > { %vm1070_vm9 = vmor %vm1068_vm8, %vm1069_vm7 }
 0x566   : > { %v1064_v16 = vmul.f32 %v1550_v14, %v1063_v15 }
 0x568   : > { %v1065_v17 = vmul.f32 0.5, %v1064_v16 }
 0x56a   : > { %v1066_v18 = vsub.f32 1.5, %v1065_v17 }
 0x56c   : > { %v1067_v19 = vmul.f32 %v1550_v14, %v1066_v18 }
 0x56e   : > { %v1071_v21 = vsel %vm1070_vm9, %v1550_v14, %v1067_v19 }
 0x56f   : > { %v1072_v23 = vmul.f32 %v1071_v21, %v1055_v5 }
 0x571   : > { %v1076_v24 = vmul.f32 %v1525_v20, %v1072_v23 }
 0x573   : > { %v1080_v25 = vadd.f32 %v1526_v22, %v1076_v24 }
 0x575   : > { %v1081_v26 = vpack.c.bf16 %v1080_v25, %v1080_v25 }
 0x577   : > { %1390 = vmatmul.msk.bf16.vlgmr.msrb.gmra.mxu0 %vm635_vm0, %v1081_v26 }
 0x5f4   : > { %v1114_v30 = vpop.f32.mrf.mxu0 }
 0x5f5   : > { %v1115_v31 = vadd.f32 %v1527_v29, %v1114_v30 }
 0x5f7   : > { %v1118_v32 = vmax.f32 %v1115_v31, 0.0 }
 0x5f9   : > { %v1119_v33 = vpack.c.bf16 %v1118_v32, %v1118_v32 }
 0x5fb   : > { %1407 = vmatmul.msk.bf16.vlgmr.msrb.gmra.mxu1 %vm1156_vm10, %v1119_v33 }
 0x5fc   : > { %v1116_v34 = vpop.f32.mrf.mxu0 }
 0x678   : > { %v1169_v36 = vpop.f32.mrf.mxu1 }
 0x679   : > { %v1170_v37 = vadd.f32 %v1528_v35, %v1169_v36 }
 0x67b   : > { %v1173_v38 = vadd.f32 %v1170_v37, %v1080_v25 }
 0x67d   : > { %v1176_v39 = vsel %vm635_vm0, %v1173_v38, 0.0 }
 0x67e   : > { %1177 = vadd.xlane.f32.xlu0 %v1176_v39 }
 0x680   : > { %v1171_v40 = vpop.f32.mrf.mxu1 }
 0x6f1   : > { %v1178_v41 = vpop.xlane.xlu0 %1177 }
 0x6f2   : > { %v1179_v42 = vmul.f32 %v1178_v41, %v1053_v1 }
 0x6f4   : > { %v1180_v43 = vsub.f32 %v1173_v38, %v1179_v42 }
 0x6f6   : > { %v1181_v44 = vmul.f32 %v1180_v43, %v1180_v43 }
 0x6f8   : > { %v1182_v45 = vsel %vm635_vm0, %v1181_v44, 0.0 }
 0x6f9   : > { %1183 = vadd.xlane.f32.xlu2 %v1182_v45 }
 0x76c   : > { %v1184_v46 = vpop.xlane.xlu2 %1183 }
 0x76d   : > { %v1185_v47 = vmul.f32 %v1184_v46, %v1053_v1 }
 0x76f   : > { %v1186_v48 = vadd.f32 1e-05, %v1185_v47 }
 0x771   : > { %1551 = vrsqrt.f32 %v1186_v48  ;;  %vm1193_vm12 = vweird.f32 %v1186_v48 }
 0x777   : > { %v1552_v49 = vpop.eup %1551 }
 0x778   : > { %v1188_v50 = vmul.f32 %v1552_v49, %v1186_v48  ;;  %vm1194_vm11 = vweird.f32 %v1552_v49 }
 0x779   : > { %vm1195_vm13 = vmor %vm1193_vm12, %vm1194_vm11 }
 0x77a   : > { %v1189_v51 = vmul.f32 %v1552_v49, %v1188_v50 }
 0x77c   : > { %v1190_v52 = vmul.f32 0.5, %v1189_v51 }
 0x77e   : > { %v1191_v53 = vsub.f32 1.5, %v1190_v52 }
 0x780   : > { %v1192_v54 = vmul.f32 %v1552_v49, %v1191_v53 }
 0x782   : > { %v1196_v56 = vsel %vm1195_vm13, %v1552_v49, %v1192_v54 }
 0x783   : > { %v1197_v57 = vmul.f32 %v1196_v56, %v1180_v43 }
 0x785   : > { %v1201_v59 = vmul.f32 %v1529_v55, %v1197_v57 }
 0x787   : > { %v1205_v60 = vadd.f32 %v1530_v58, %v1201_v59 }
 0x789   : > { %1206 = vst.msk [vmem:[%s603_s23] sm:$0xff] %vm635_vm0, %v1205_v60 }
 0x78a   : > { %1670 = shalt.err (!%p1667_p9)
}
 0x78b   : > { %1438 = dma.vmem_to_hbm [thread:$0]  (%p1873_p4), %s1222_s27, 128, %s1224_s2, %s1208_s28  }
 0x78c PF: > { %s2140_s0 = sld [smem:[#allocation17_spill]] }
 0x78d   : > { %s2141_s29 = sld [smem:[#allocation14_spill]] }
 0x792   : > { %p1460_p10 = scmp.ge.s32.totalorder %s2140_s0, 2 }
 0x793   : > { %s1235_s22 = sand.u32 1, %s2141_s29  }
 0x794   : > { %p1451_p11 = pnand %p1460_p10, %p1880_p8  ;;  %s1236_s24 = scalar_lea.sflag [#allocation6], %s1235_s22 }
 0x796   : > { %p1452_p12 = pneg %p1451_p11 }
 0x798   : > { %1704 = dma.done.wait (%p1452_p12), %s1236_s24, 128  }
 0x799   : > { %1706 = vsyncadd (%p1452_p12), %s1236_s24, 4294967168  ;;  %s32_s29 = sadd.s32 1, %s2140_s0   ;;  %s2143_s23 = sld [smem:[#allocation15_spill]] }
 0x79a   : > { %p29_p13 = scmp.ge.s32.totalorder %s32_s29, 4   ;;  %s2144_s26 = sld [smem:[#allocation21_spill]] }
 0x79b   : > { %s2145_s27 = sld [smem:[#allocation16_spill]]  ;;  %s2147_s24 = smov %s1713_s25 }
 0x79c   : > { %s2146_s28 = sld [smem:[#allocation18_spill]]  ;;  %31 = sbr.rel (!%p29_p13) target bundleno = 14 (0xe), region = 147 }
 0x79f   : > { %s2148_s25 = smov %s2143_s23 }
 0x7a1   :  { %1242 = vsyncpa [#allocation5], 1 }
 0x7a2   :  { %1244 = vsyncpa [#allocation5 + $0x1], 1 }
 0x7a3   :  { %1245 = vsyncpa [#allocation8], 1 }
 0x7a4   :  { %1246 = vsyncpa [#allocation6], 1 }
 0x7a5   :  { %1248 = vsyncpa [#allocation6 + $0x1], 1 }

// kernel: tpu_custom_call.1
= control target key start
LH: loop header
LB: loop body
LE: loop exit
PB: predicated region body
PF: predicated region fallthrough
CT: control target
= control target key end

     0   :  { %s2082_s0 = inlined_call_operand.vmem [shape: f32[2,8,32], index: 0, kind: input, shape index: {}]   ;;  %s2083_s1 = inlined_call_operand.vmem [shape: bf16[32,32], index: 1, kind: input, shape index: {}]   ;;  %s2084_s2 = inlined_call_operand.vmem [shape: f32[1,32], index: 2, kind: input, shape index: {}]   ;;  %s2085_s3 = inlined_call_operand.vmem [shape: bf16[32,32], index: 3, kind: input, shape index: {}]   ;;  %s2086_s4 = inlined_call_operand.vmem [shape: f32[1,32], index: 4, kind: input, shape index: {}]   ;;  %s2087_s5 = inlined_call_operand.hbm [shape: bf16[32,32], index: 5, kind: input, shape index: {}]   ;;  %s2088_s6 = inlined_call_operand.vmem [shape: f32[1,32], index: 6, kind: input, shape index: {}]   ;;  %s2089_s7 = inlined_call_operand.hbm [shape: bf16[32,32], index: 7, kind: input, shape index: {}]   ;;  %s2090_s8 = inlined_call_operand.vmem [shape: f32[1,32], index: 8, kind: input, shape index: {}]   ;;  %s2091_s9 = inlined_call_operand.vmem [shape: f32[1,32], index: 9, kind: input, shape index: {}]   ;;  %s2092_s10 = inlined_call_operand.vmem [shape: f32[1,32], index: 10, kind: input, shape index: {}]   ;;  %s2093_s11 = inlined_call_operand.hbm [shape: bf16[32,64], index: 11, kind: input, shape index: {}]   ;;  %s2094_s12 = inlined_call_operand.vmem [shape: f32[1,64], index: 12, kind: input, shape index: {}]   ;;  %s2095_s13 = inlined_call_operand.vmem [shape: bf16[64,32], index: 13, kind: input, shape index: {}]   ;;  %s2096_s14 = inlined_call_operand.vmem [shape: f32[1,32], index: 14, kind: input, shape index: {}]   ;;  %s2097_s15 = inlined_call_operand.vmem [shape: f32[1,32], index: 15, kind: input, shape index: {}]   ;;  %s2098_s16 = inlined_call_operand.vmem [shape: f32[1,32], index: 16, kind: input, shape index: {}]   ;;  %s2099_s17 = inlined_call_operand.hbm [shape: f32[2,8,32], index: 17, kind: output, shape index: {}]  }
   0x1   :  { %2111 = sst [smem:[#allocation22_spill]] %s2082_s0 }
   0x2   :  { %2112 = sst [smem:[#allocation23_spill]] %s2083_s1 }
   0x3   :  { %2113 = sst [smem:[#allocation24_spill]] %s2084_s2 }
   0x4   :  { %2114 = sst [smem:[#allocation25_spill]] %s2089_s7 }
   0x5   :  { %2115 = sst [smem:[#allocation26_spill]] %s2097_s15 }
   0x6   :  { %2116 = sst [smem:[#allocation27_spill]] %s2098_s16 }
   0x7   :  { %2117 = sst [smem:[#allocation28_spill]] %s2099_s17 }
   0x8   :  { %22 = vsyncpa [#allocation5], 0 }
   0x9   :  { %23 = vsyncpa [#allocation8], 0 }
   0xa   :  { %24 = vsyncpa [#allocation6], 0 }
   0xb   :  { %26 = vsyncpa [#allocation6 + $0x1], 0  ;;  %s1833_s24 = smov 0   ;;  %s1835_s25 = smov 0  }
   0xc   :  { %s1837_s26 = smov 0   ;;  %s1839_s27 = smov 0  }
   0xd   :  { %s1841_s28 = smov 0   ;;  %s1843_s29 = smov 0  }
   0xe LB: > { %2118 = sst [smem:[#allocation14_spill]] %s1709_s24  ;;  %s1325_s0 = sadd.s32 4294967295, %s1729_s29   ;;  %s1729_s29 = sphi %s1843_s29, %s32_s29   ;;  %s1725_s28 = sphi %s1841_s28, %s2146_s28   ;;  %s1721_s27 = sphi %s1839_s27, %s2145_s27   ;;  %s1717_s26 = sphi %s1837_s26, %s2144_s26   ;;  %s1713_s25 = sphi %s1835_s25, %s2148_s25   ;;  %s1709_s24 = sphi %s1833_s24, %s2147_s24  }
   0xf   : > { %2119 = sst [smem:[#allocation15_spill]] %s1717_s26  ;;  %s1326_s30 = sadd.s32 4294967294, %s1729_s29  }
  0x10   : > { %2120 = sst [smem:[#allocation16_spill]] %s1725_s28  ;;  %s44_s18 = sadd.s32 1, %s1725_s28 }
  0x11   : > { %2121 = sst [smem:[#allocation17_spill]] %s1729_s29  ;;  %s415_s19 = sadd.s32 1, %s1717_s26 }
  0x12   : > { %p46_p0 = scmp.ge.s32.totalorder %s44_s18, 2  ;;  %p425_p1 = scmp.ne.s32.totalorder %s1717_s26, %s1713_s25 }
  0x13   : > { %p426_p2 = scmp.eq.s32.totalorder %s1325_s0, 1  ;;  %p431_p3 = scmp.ne.s32.totalorder %s1713_s25, %s1709_s24 }
  0x14   : > { %s2150_s18 = smov (%p46_p0, %s44_s18), 0  ;;  %p432_p5 = scmp.eq.s32.totalorder %s1326_s30, 1 }
  0x15   : > { %2122 = sst [smem:[#allocation18_spill]] %s2150_s18  ;;  %p1873_p4 = por %p426_p2, %p425_p1 }
  0x16   : > { %s410_s20 = ssub.s32 %s1725_s28, %s2150_s18  ;;  %p1327_p6 = scmp.ge.s32.totalorder %s1729_s29, 1 }
  0x17   : > { %s2123_s1 = scalar_select %p1873_p4, 1, 0 }
  0x18   : > { %p413_p7 = scmp.eq.s32.totalorder %s410_s20, 0  ;;  %p1880_p8 = por %p432_p5, %p431_p3 }
  0x19   : > { %2124 = sst [smem:[#allocation19_spill]] %s2123_s1  ;;  %p439_p9 = scmp.lt.s32.totalorder %s1729_s29, 3 }
  0x1a   : > { %s2125_s21 = scalar_select %p1880_p8, 1, 0 }
  0x1b   : > { %s1886_s22 = scalar_select %p413_p7, %s1717_s26, %s415_s19  }
  0x1c   : > { %2126 = sst [smem:[#allocation20_spill]] %s2125_s21  ;;  %p1888_p10 = pnand %p1327_p6, %p439_p9 }
  0x1d   : > { %2127 = sst [smem:[#allocation21_spill]] %s1886_s22  ;;  %p1892_p11 = scmp.eq.s32.totalorder %s1325_s0, 0 }
  0x1e   : > { %p1440_p12 = pneg %p1888_p10  ;;  %s2130_s7 = sld [smem:[#allocation25_spill]] }
  0x1f   : > { %s1731_s28 = smov [#allocation7]   ;;  %s1732_s22 = smov 64  }
  0x20   : > { %p1903_p13 = pnand %p1892_p11, %p1440_p12  ;;  %s481_s0 = sshll.u32 %s1731_s28, 4  ;;  %s482_s0 = int_to_ptr.vmem [resolvable:$true] %s481_s0 }
  0x21   : > { %s1733_s26 = smov 4   ;;  %s462_s30 = sshll.u32 %s2087_s5, 4  ;;  %s463_s30 = int_to_ptr.hbm [resolvable:$true] %s462_s30 }
  0x22   : > { %s1734_s20 = smov [#allocation4]   ;;  %s502_s17 = sshll.u32 %s2093_s11, 4  ;;  %s503_s17 = int_to_ptr.hbm [resolvable:$true] %s502_s17 }
  0x23   : > { %s1735_s28 = smov [#allocation9]  }
  0x24   : > { %s479_s18 = sshll.u32 %s2130_s7, 4  ;;  %s464_s7 = sshll.u32 %s1734_s20, 4  ;;  %s480_s18 = int_to_ptr.hbm [resolvable:$true] %s479_s18  ;;  %s465_s7 = int_to_ptr.vmem [resolvable:$true] %s464_s7 }
  0x25   : > { %1446 = dma.hbm_to_vmem [thread:$0]  (!%p1903_p13), %s480_s18, 256, %s482_s0, [#allocation8], %s1732_s22, %s1732_s22, %s1733_s26  }
  0x26   : > { %1443 = dma.hbm_to_vmem [thread:$0]  (!%p1903_p13), %s463_s30, 256, %s465_s7, [#allocation5], %s1732_s22, %s1732_s22, %s1733_s26  }
  0x27   : > { %s504_s15 = sshll.u32 %s1735_s28, 4  ;;  %542 = sbr.rel (%p1888_p10) target bundleno = 1932 (0x78c), region = 88  ;;  %s505_s15 = int_to_ptr.vmem [resolvable:$true] %s504_s15 }
  0x28   : > { %1449 = dma.hbm_to_vmem [thread:$0]  (!%p1903_p13), %s503_s17, 256, %s505_s15, [#allocation8], %s1732_s22, %s1732_s22, %s1733_s26  }
  0x2c   : > { %1696 = dma.done.wait (%p1892_p11), [#allocation5], 256  }
  0x2d   : > { %1698 = vsyncadd (%p1892_p11), [#allocation5], 4294967040 }
  0x2e   : > { %1700 = dma.done.wait (%p1892_p11), [#allocation8], 512  }
  0x2f   : > { %1702 = vsyncadd (%p1892_p11), [#allocation8], 4294966784  ;;  %p604_p0 = scmp.lt.s32.totalorder %s1721_s27, 1  ;;  %s2132_s26 = sld [smem:[#allocation22_spill]]  ;;  %v1413_v0 = vld [vmem:[%s2085_s3 + $0x8] sm:$0xff]  ;;  %v1412_v1 = vld [vmem:[%s2085_s3] sm:$0xff] }
  0x30   : > { %s2133_s19 = sld [smem:[#allocation23_spill]]  ;;  %645 = vmatpush.bf16.msra.mxu0 %v1413_v0  ;;  %vm635_vm0 = vcmask 261120   ;;  %v1521_v6 = vld [vmem:[%s2086_s4] ss:$0 sm:$0xff]  ;;  %vm686_vm1 = vcmask 60416   ;;  %s1736_s16 = smov 112  }
  0x31   : > { %s605_s7 = scalar_select %p604_p0, %s1721_s27, 1  ;;  %vm781_vm2 = vcmask 64512   ;;  %v1415_v18 = vld [vmem:[#allocation4 + $0x8] sm:$0xff]  ;;  %v1414_v19 = vld [vmem:[#allocation4] sm:$0xff]  ;;  %vm913_vm3 = vcmask 1043456   ;;  %vm1000_vm4 = vcmask 130048  }
  0x32   : > { %s2134_s2 = sld [smem:[#allocation24_spill]]  ;;  %s1737_s17 = smov 104   ;;  %678 = vmatpush.bf16.msra.mxu1 %v1415_v18  ;;  %v1523_v37 = vld [vmem:[%s2088_s6] ss:$0 sm:$0xff]  ;;  %vm1002_vm5 = vcmask 195584   ;;  %vm1156_vm10 = vcmask 523264  }
  0x33   : > { %s1337_s15 = sshll.u32 %s605_s7, 3  ;;  %s1739_s1 = smov 8  }
  0x34   : > { %646 = vmatpush.bf16.msra.mxu0 %v1412_v1  ;;  %s1740_s21 = smov 16   ;;  %s1741_s22 = smov 24  }
  0x35   : > { %s607_s29 = scalar_lea.vmem %s2132_s26, %s1337_s15  ;;  %s1738_s26 = smov 120  }
  0x36   : > { %v1940_v2 = vld [vmem:[%s607_s29] sm:$0xff]  ;;  %v1417_v3 = vld [vmem:[%s2133_s19 + $0x8] sm:$0xff]  ;;  %679 = vmatpush.bf16.msra.mxu1 %v1414_v19  ;;  %s601_s0 = sand.u32 1, %s1713_s25   ;;  %s1409_s20 = sshll.u32 %s1721_s27, 3 }
  0x37   : > { %v1416_v4 = vld [vmem:[%s2133_s19] sm:$0xff]  ;;  %756 = vmatpush.bf16.msra.mxu2 %v1417_v3  ;;  %v614_v5 = vpack.c.bf16 %v1940_v2, %v1940_v2  ;;  %s1336_s30 = sshll.u32 %s601_s0, 3  ;;  %s2135_s15 = sld [smem:[#allocation26_spill]] }
  0x38   : > { %v1522_v10 = vld [vmem:[%s2134_s2] ss:$0 sm:$0xff]  ;;  %s2139_s24 = sld [smem:[#allocation27_spill]]  ;;  %s603_s23 = scalar_lea.vmem [#allocation10], %s1336_s30 }
  0x39   : > { %1346 = vmatmul.msk.bf16.vlgmr.msra.gmra.mxu0 %vm635_vm0, %v614_v5  ;;  %1355 = vmatmul.msk.bf16.vlgmr.msra.gmra.mxu1 %vm635_vm0, %v614_v5  ;;  %s1221_s27 = sshll.u32 %s603_s23, 4  ;;  %s1208_s28 = scalar_lea.sflag [#allocation6], %s601_s0  ;;  %s1222_s27 = int_to_ptr.vmem [resolvable:$true] %s1221_s27 }
  0x3b   : > { %757 = vmatpush.bf16.msra.mxu2 %v1416_v4 }
  0x3e   : > { %1364 = vmatmul.msk.bf16.vlgmr.msra.gmra.mxu2 %vm635_vm0, %v614_v5 }
  0xb6   : > { %v648_v7 = vpop.f32.mrf.mxu0  ;;  %v681_v38 = vpop.f32.mrf.mxu1 }
  0xb7   : > { %v649_v8 = vadd.f32 %v1521_v6, %v648_v7  ;;  %v682_v39 = vadd.f32 %v1523_v37, %v681_v38 }
  0xb9   : > { %v685_v9 = vpack.c.bf16 %v649_v8, %v649_v8  ;;  %v688_v40 = vpack.c.bf16 %v682_v39, %v682_v39 }
  0xbb   : > { %687 = vst.msk [vmem:[#allocation2] sm:$0xf] %vm686_vm1, %v685_v9  ;;  %702 = vrot.lane.b32.xlu1 %v685_v9, %s1736_s16  ;;  %712 = vrot.lane.b32.xlu0 %v685_v9, %s1737_s17 }
  0xbc   : > { %689 = vst.msk [vmem:[#allocation3] sm:$0xf] %vm686_vm1, %v688_v40 }
  0xbe   : > { %v650_v12 = vpop.f32.mrf.mxu0  ;;  %v683_v41 = vpop.f32.mrf.mxu1 }
  0xc1   : > { %v759_v11 = vpop.f32.mrf.mxu2 }
  0xc2   : > { %v760_v13 = vadd.f32 %v1522_v10, %v759_v11  ;;  %v777_v14 = vld [vmem:[#allocation2] sm:$0xf] }
  0xc3   : > { %691 = vrot.lane.b32.xlu0 %v685_v9, %s1738_s26  ;;  %v786_v15 = vsel %vm781_vm2, %v777_v14, 0  ;;  %v906_v44 = vld [vmem:[#allocation3] sm:$0xf] }
  0xc4   : > { %764 = vrot.lane.b32.xlu2 %v760_v13, %s1738_s26  ;;  %770 = vrot.lane.b32.xlu1 %v760_v13, %s1737_s17  ;;  %v773_v17 = vpack.c.bf16 %v760_v13, %v760_v13  ;;  %v915_v45 = vsel %vm913_vm3, %v906_v44, 0  ;;  %v1419_v44 = vld [vmem:[#allocation7 + $0x8] sm:$0xff] }
  0xc5   : > { %795 = vmatpush.bf16.xpose.msra.mxu3 %v786_v15 }
  0xc9   : > { %v761_v16 = vpop.f32.mrf.mxu2 }
  0xcc   : > { %767 = vrot.lane.b32.xlu2 %v760_v13, %s1736_s16  ;;  %1365 = vmatmul.msk.bf16.vlgmr.msra.gmra.mxu3 %vm781_vm2, %v773_v17 }
  0xcd   : > { %924 = vmatpush.bf16.msrb.mxu3 %v915_v45  ;;  %v1418_v45 = vld [vmem:[#allocation7] sm:$0xff] }
  0xd1   : > { %1034 = vmatpush.bf16.msra.mxu3 %v1419_v44 }
  0xd5   : > { %1035 = vmatpush.bf16.msra.mxu3 %v1418_v45 }
 0x11e   : > { %v765_v22 = vpop.permute.xlu2 %764 }
 0x11f   : > { %v774_v34 = vpack.c.bf16 %v765_v22, %v765_v22 }
 0x126   : > { %v768_v29 = vpop.permute.xlu2 %767 }
 0x127   : > { %v775_v31 = vpack.c.bf16 %v768_v29, %v768_v29 }
 0x12d   : > { %v703_v20 = vpop.permute.xlu1 %702  ;;  %v713_v21 = vpop.permute.xlu0 %712 }
 0x12e   : > { %706 = vst.msk [vmem:[#allocation2 + $0x8] sm:$0xf] %vm686_vm1, %v703_v20 }
 0x12f   : > { %716 = vst.msk [vmem:[#allocation2 + $0xc] sm:$0xf] %vm686_vm1, %v713_v21 }
 0x135   : > { %v692_v23 = vpop.permute.xlu0 %691  ;;  %v779_v24 = vld [vmem:[#allocation2 + $0x8] sm:$0xf] }
 0x136   : > { %695 = vst.msk [vmem:[#allocation2 + $0x4] sm:$0xf] %vm686_vm1, %v692_v23  ;;  %v824_v25 = vsel %vm781_vm2, %v779_v24, 0  ;;  %v780_v26 = vld [vmem:[#allocation2 + $0xc] sm:$0xf]  ;;  %v771_v28 = vpop.permute.xlu1 %770 }
 0x137   : > { %833 = vmatpush.bf16.xpose.msrb.mxu1 %v824_v25  ;;  %v843_v27 = vsel %vm781_vm2, %v780_v26, 0  ;;  %v776_v30 = vpack.c.bf16 %v771_v28, %v771_v28 }
 0x138   : > { %852 = vmatpush.bf16.xpose.msrb.mxu2 %v843_v27 }
 0x13d   : > { %v778_v32 = vld [vmem:[#allocation2 + $0x4] sm:$0xf] }
 0x13e   : > { %1367 = vmatmul.msk.bf16.vlgmr.msrb.gmra.mxu1 %vm781_vm2, %v775_v31  ;;  %v805_v33 = vsel %vm781_vm2, %v778_v32, 0 }
 0x13f   : > { %1368 = vmatmul.msk.bf16.vlgmr.msrb.gmra.mxu2 %vm781_vm2, %v776_v30  ;;  %814 = vmatpush.bf16.xpose.msrb.mxu0 %v805_v33 }
 0x146   : > { %1366 = vmatmul.msk.bf16.vlgmr.msrb.gmra.mxu0 %vm781_vm2, %v774_v34 }
 0x14f   : > { %v797_v35 = vpop.f32.mrf.mxu3 }
 0x150   : > { %v858_v51 = vsel %vm781_vm2, %v797_v35, -inf }
 0x157   : > { %v799_v36 = vpop.f32.mrf.mxu3 }
 0x1bb   : > { %v835_v42 = vpop.f32.mrf.mxu1 }
 0x1bc   : > { %v864_v43 = vsel %vm781_vm2, %v835_v42, -inf }
 0x1bd   : > { %865 = vmax.xlane.f32.xlu2 %v864_v43 }
 0x1c2   : > { %v854_v46 = vpop.f32.mrf.mxu2 }
 0x1c3   : > { %v837_v47 = vpop.f32.mrf.mxu1  ;;  %v867_v48 = vsel %vm781_vm2, %v854_v46, -inf  ;;  %v816_v49 = vpop.f32.mrf.mxu0 }
 0x1c4   : > { %868 = vmax.xlane.f32.xlu0 %v867_v48  ;;  %v861_v50 = vsel %vm781_vm2, %v816_v49, -inf }
 0x1c5   : > { %862 = vmax.xlane.f32.xlu1 %v861_v50  ;;  %859 = vmax.xlane.f32.xlu2 %v858_v51 }
 0x1ca   : > { %v856_v52 = vpop.f32.mrf.mxu2 }
 0x1cb   : > { %v818_v53 = vpop.f32.mrf.mxu0 }
 0x1cc   : > { %v1524_v53 = vld [vmem:[%s2090_s8] ss:$0 sm:$0xff] }
 0x1d8   : > { %717 = vrot.lane.b32.xlu0 %v688_v40, %s1737_s17 }
 0x1dd   : > { %697 = vrot.lane.b32.xlu2 %v688_v40, %s1738_s26  ;;  %s2136_s26 = sld [smem:[#allocation28_spill]] }
 0x1e3   : > { %s2137_s18 = smov %s2136_s26  ;;  %s1219_s29 = scalar_lea.hbm %s2136_s26, %s1409_s20 }
 0x1e4   : > { %s1223_s2 = sshll.u32 %s1219_s29, 4  ;;  %s1663_s30 = scalar_lea.hbm %s2137_s18, 16  ;;  %s1224_s2 = int_to_ptr.hbm [resolvable:$true] %s1223_s2 }
 0x1e5   : > { %s1657_s7 = sshra.s32 %s1224_s2, 4  ;;  %s1658_s7 = int_to_ptr.hbm [resolvable:$true] %s1657_s7 }
 0x1e6   : > { %s1659_s20 = scalar_lea.hbm %s1658_s7, 8  ;;  %p1664_p5 = scmp.lt.s32.totalorder %s1658_s7, %s2137_s18 }
 0x1e7   : > { %p1660_p1 = scmp.ne.s32.totalorder %s1658_s7, %s1659_s20  ;;  %p1665_p6 = scmp.lt.s32.totalorder %s1663_s30, %s1659_s20 }
 0x1e9   : > { %p1661_p2 = pnand %p1660_p1, %p1873_p4  ;;  %p1666_p7 = por %p1665_p6, %p1664_p5 }
 0x1eb   : > { %p1662_p3 = pneg %p1661_p2 }
 0x1ed   : > { %p1667_p9 = pnand %p1666_p7, %p1662_p3 }
 0x230   : > { %v866_v54 = vpop.xlane.xlu2 %865 }
 0x231   : > { %v872_v55 = vsub.f32 %v835_v42, %v866_v54 }
 0x233   : > { %v878_v56 = vmul.f32 1.442695, %v872_v55 }
 0x235   : > { %1531 = vpow2.f32 %v878_v56 }
 0x237   : > { %v869_v57 = vpop.xlane.xlu0 %868 }
 0x238   : > { %v863_v58 = vpop.xlane.xlu1 %862  ;;  %v860_v59 = vpop.xlane.xlu2 %859  ;;  %v873_v63 = vsub.f32 %v854_v46, %v869_v57 }
 0x239   : > { %v871_v60 = vsub.f32 %v816_v49, %v863_v58  ;;  %v870_v61 = vsub.f32 %v797_v35, %v860_v59  ;;  %v1742_v59 = vmov 32.0  }
 0x23a   : > { %v880_v4 = vmul.f32 1.442695, %v873_v63 }
 0x23b   : > { %v1532_v62 = vpop.eup %1531  ;;  %v876_v0 = vmul.f32 1.442695, %v871_v60  ;;  %v874_v1 = vmul.f32 1.442695, %v870_v61 }
 0x23c   : > { %v888_v3 = vsel %vm781_vm2, %v1532_v62, 0.0 }
 0x23d   : > { %1533 = vpow2.f32 %v876_v0  ;;  %889 = vadd.xlane.f32.xlu0 %v888_v3 }
 0x23e   : > { %1535 = vpow2.f32 %v874_v1 }
 0x23f   : > { %1537 = vpow2.f32 %v880_v4 }
 0x240   : > { %v698_v5 = vpop.permute.xlu2 %697 }
 0x241   : > { %701 = vst.msk [vmem:[#allocation3 + $0x4] sm:$0xf] %vm686_vm1, %v698_v5 }
 0x243   : > { %v1534_v6 = vpop.eup %1533 }
 0x244   : > { %v1536_v7 = vpop.eup %1535  ;;  %v885_v8 = vsel %vm781_vm2, %v1534_v6, 0.0 }
 0x245   : > { %886 = vadd.xlane.f32.xlu1 %v885_v8  ;;  %v882_v9 = vsel %vm781_vm2, %v1536_v7, 0.0  ;;  %v1538_v11 = vpop.eup %1537  ;;  %v1420_v8 = vld [vmem:[#allocation9] sm:$0xff] }
 0x246   : > { %883 = vadd.xlane.f32.xlu2 %v882_v9  ;;  %v891_v14 = vsel %vm781_vm2, %v1538_v11, 0.0  ;;  %v1425_v9 = vld [vmem:[%s2095_s13 + $0x18] sm:$0xff] }
 0x248   : > { %v907_v10 = vld [vmem:[#allocation3 + $0x4] sm:$0xf] }
 0x249   : > { %v934_v12 = vsel %vm913_vm3, %v907_v10, 0 }
 0x24a   : > { %943 = vmatpush.bf16.msra.mxu0 %v934_v12  ;;  %v718_v13 = vpop.permute.xlu0 %717  ;;  %v1424_v12 = vld [vmem:[%s2095_s13 + $0x10] sm:$0xff] }
 0x24b   : > { %721 = vst.msk [vmem:[#allocation3 + $0xc] sm:$0xf] %vm686_vm1, %v718_v13 }
 0x24d   : > { %892 = vadd.xlane.f32.xlu1 %v891_v14 }
 0x252   : > { %v909_v15 = vld [vmem:[#allocation3 + $0xc] sm:$0xf] }
 0x253   : > { %v972_v16 = vsel %vm913_vm3, %v909_v15, 0 }
 0x254   : > { %981 = vmatpush.bf16.msra.mxu2 %v972_v16 }
 0x266   : > { %707 = vrot.lane.b32.xlu1 %v688_v40, %s1736_s16 }
 0x2b0   : > { %v890_v29 = vpop.xlane.xlu0 %889 }
 0x2b8   : > { %v887_v17 = vpop.xlane.xlu1 %886 }
 0x2b9   : > { %1539 = vrcp.f32 %v887_v17  ;;  %v884_v18 = vpop.xlane.xlu2 %883 }
 0x2ba   : > { %1541 = vrcp.f32 %v884_v18 }
 0x2bf   : > { %v1540_v19 = vpop.eup %1539 }
 0x2c0   : > { %v1542_v20 = vpop.eup %1541  ;;  %v899_v21 = vmul.f32 %v1540_v19, %v1534_v6  ;;  %v893_v22 = vpop.xlane.xlu1 %892 }
 0x2c1   : > { %v898_v23 = vmul.f32 %v1542_v20, %v1536_v7  ;;  %1543 = vrcp.f32 %v893_v22  ;;  %v1525_v20 = vld [vmem:[%s2091_s9] ss:$0 sm:$0xff] }
 0x2c2   : > { %v903_v24 = vpack.c.bf16 %v899_v21, %v899_v21  ;;  %1545 = vrcp.f32 %v890_v29  ;;  %v1526_v22 = vld [vmem:[%s2092_s10] ss:$0 sm:$0xff] }
 0x2c3   : > { %v902_v25 = vpack.c.bf16 %v898_v23, %v898_v23  ;;  %1547 = vrcp.f32 %v1742_v59  ;;  %v1527_v29 = vld [vmem:[%s2094_s12] ss:$0 sm:$0xff] }
 0x2c4   : > { %1370 = vmatmul.msk.bf16.vlgmr.msra.gmra.mxu0 %vm781_vm2, %v903_v24 }
 0x2c5   : > { %1369 = vmatmul.msk.bf16.vlgmr.msrb.gmra.mxu3 %vm781_vm2, %v902_v25 }
 0x2c7   : > { %v1544_v26 = vpop.eup %1543 }
 0x2c8   : > { %v901_v27 = vmul.f32 %v1544_v26, %v1538_v11  ;;  %v1546_v31 = vpop.eup %1545 }
 0x2c9   : > { %v900_v32 = vmul.f32 %v1546_v31, %v1532_v62  ;;  %v1548_v60 = vpop.eup %1547 }
 0x2ca   : > { %v905_v28 = vpack.c.bf16 %v901_v27, %v901_v27  ;;  %v1048_v61 = vmul.f32 32.0, %v1548_v60  ;;  %vm1052_vm6 = vweird.f32 %v1548_v60  ;;  %v1423_v27 = vld [vmem:[%s2095_s13 + $0x8] sm:$0xff] }
 0x2cb   : > { %v904_v35 = vpack.c.bf16 %v900_v32, %v900_v32 }
 0x2cc   : > { %1372 = vmatmul.msk.bf16.vlgmr.msra.gmra.mxu2 %vm781_vm2, %v905_v28  ;;  %v1049_v62 = vsub.f32 1.0, %v1048_v61  ;;  %v1422_v28 = vld [vmem:[%s2095_s13] sm:$0xff] }
 0x2ce   : > { %v1050_v63 = vmul.f32 %v1548_v60, %v1049_v62 }
 0x2d0   : > { %v1051_v0 = vadd.f32 %v1548_v60, %v1050_v63 }
 0x2d2   : > { %v1053_v1 = vsel %vm1052_vm6, %v1548_v60, %v1051_v0 }
 0x2d8   : > { %v708_v30 = vpop.permute.xlu1 %707 }
 0x2d9   : > { %711 = vst.msk [vmem:[#allocation3 + $0x8] sm:$0xf] %vm686_vm1, %v708_v30 }
 0x2e0   : > { %v908_v33 = vld [vmem:[#allocation3 + $0x8] sm:$0xf] }
 0x2e1   : > { %v953_v34 = vsel %vm913_vm3, %v908_v33, 0 }
 0x2e2   : > { %962 = vmatpush.bf16.msra.mxu1 %v953_v34 }
 0x2e5   : > { %1371 = vmatmul.msk.bf16.vlgmr.msra.gmra.mxu1 %vm781_vm2, %v904_v35  ;;  %v1528_v35 = vld [vmem:[%s2096_s14] ss:$0 sm:$0xff] }
 0x2e6   : > { %1164 = vmatpush.bf16.msrb.mxu1 %v1425_v9 }
 0x2ea   : > { %1165 = vmatpush.bf16.msrb.mxu1 %v1424_v12 }
 0x2ee   : > { %1166 = vmatpush.bf16.msrb.mxu1 %v1423_v27 }
 0x2f2   : > { %1167 = vmatpush.bf16.msrb.mxu1 %v1422_v28 }
 0x341   : > { %v945_v36 = vpop.f32.mrf.mxu0 }
 0x342   : > { %988 = vrot.lane.b32.xlu1 %v945_v36, %s1739_s1 }
 0x348   : > { %v926_v37 = vpop.f32.mrf.mxu3 }
 0x349   : > { %v947_v38 = vpop.f32.mrf.mxu0 }
 0x34f   : > { %v983_v39 = vpop.f32.mrf.mxu2 }
 0x350   : > { %v928_v40 = vpop.f32.mrf.mxu3 }
 0x357   : > { %v985_v41 = vpop.f32.mrf.mxu2 }
 0x362   : > { %v964_v42 = vpop.f32.mrf.mxu1 }
 0x363   : > { %992 = vrot.lane.b32.xlu1 %v964_v42, %s1740_s21 }
 0x36a   : > { %v966_v43 = vpop.f32.mrf.mxu1 }
 0x36b   : > { %996 = vrot.lane.b32.xlu1 %v983_v39, %s1741_s22 }
 0x3b4   : > { %v989_v46 = vpop.permute.xlu1 %988 }
 0x3b5   : > { %v999_v48 = vsel %vm781_vm2, %v926_v37, %v989_v46 }
 0x3d5   : > { %v993_v47 = vpop.permute.xlu1 %992 }
 0x3d6   : > { %v1001_v49 = vsel %vm1000_vm4, %v999_v48, %v993_v47 }
 0x3dd   : > { %v997_v50 = vpop.permute.xlu1 %996 }
 0x3de   : > { %v1003_v51 = vsel %vm1002_vm5, %v1001_v49, %v997_v50 }
 0x3df   : > { %v1004_v52 = vpack.c.bf16 %v1003_v51, %v1003_v51 }
 0x3e1   : > { %1381 = vmatmul.msk.bf16.vlgmr.msra.gmra.mxu3 %vm635_vm0, %v1004_v52 }
 0x464   : > { %v1037_v54 = vpop.f32.mrf.mxu3 }
 0x465   : > { %v1038_v55 = vadd.f32 %v1524_v53, %v1037_v54 }
 0x467   : > { %v1041_v56 = vadd.f32 %v1038_v55, %v1940_v2  ;;  %v1421_v2 = vld [vmem:[#allocation9 + $0x8] sm:$0xff]  ;;  %v1529_v55 = vld [vmem:[%s2135_s15] ss:$0 sm:$0xff] }
 0x468   : > { %1111 = vmatpush.bf16.msrb.mxu0 %v1421_v2 }
 0x469   : > { %v1044_v57 = vsel %vm635_vm0, %v1041_v56, 0.0 }
 0x46a   : > { %1045 = vadd.xlane.f32.xlu0 %v1044_v57 }
 0x46c   : > { %v1039_v58 = vpop.f32.mrf.mxu3  ;;  %1112 = vmatpush.bf16.msrb.mxu0 %v1420_v8 }
 0x46d   : > { %v1530_v58 = vld [vmem:[%s2139_s24] ss:$0 sm:$0xff] }
 0x4dd   : > { %v1046_v3 = vpop.xlane.xlu0 %1045 }
 0x4de   : > { %v1054_v4 = vmul.f32 %v1053_v1, %v1046_v3 }
 0x4e0   : > { %v1055_v5 = vsub.f32 %v1041_v56, %v1054_v4 }
 0x4e2   : > { %v1056_v6 = vmul.f32 %v1055_v5, %v1055_v5 }
 0x4e4   : > { %v1057_v7 = vsel %vm635_vm0, %v1056_v6, 0.0 }
 0x4e5   : > { %1058 = vadd.xlane.f32.xlu1 %v1057_v7 }
 0x558   : > { %v1059_v10 = vpop.xlane.xlu1 %1058 }
 0x559   : > { %v1060_v11 = vmul.f32 %v1059_v10, %v1053_v1 }
 0x55b   : > { %v1061_v13 = vadd.f32 1e-05, %v1060_v11 }
 0x55d   : > { %1549 = vrsqrt.f32 %v1061_v13  ;;  %vm1068_vm8 = vweird.f32 %v1061_v13 }
 0x563   : > { %v1550_v14 = vpop.eup %1549 }
 0x564   : > { %v1063_v15 = vmul.f32 %v1550_v14, %v1061_v13  ;;  %vm1069_vm7 = vweird.f32 %v1550_v14 }
 0x565   : > { %vm1070_vm9 = vmor %vm1068_vm8, %vm1069_vm7 }
 0x566   : > { %v1064_v16 = vmul.f32 %v1550_v14, %v1063_v15 }
 0x568   : > { %v1065_v17 = vmul.f32 0.5, %v1064_v16 }
 0x56a   : > { %v1066_v18 = vsub.f32 1.5, %v1065_v17 }
 0x56c   : > { %v1067_v19 = vmul.f32 %v1550_v14, %v1066_v18 }
 0x56e   : > { %v1071_v21 = vsel %vm1070_vm9, %v1550_v14, %v1067_v19 }
 0x56f   : > { %v1072_v23 = vmul.f32 %v1071_v21, %v1055_v5 }
 0x571   : > { %v1076_v24 = vmul.f32 %v1525_v20, %v1072_v23 }
 0x573   : > { %v1080_v25 = vadd.f32 %v1526_v22, %v1076_v24 }
 0x575   : > { %v1081_v26 = vpack.c.bf16 %v1080_v25, %v1080_v25 }
 0x577   : > { %1390 = vmatmul.msk.bf16.vlgmr.msrb.gmra.mxu0 %vm635_vm0, %v1081_v26 }
 0x5f4   : > { %v1114_v30 = vpop.f32.mrf.mxu0 }
 0x5f5   : > { %v1115_v31 = vadd.f32 %v1527_v29, %v1114_v30 }
 0x5f7   : > { %v1118_v32 = vmax.f32 %v1115_v31, 0.0 }
 0x5f9   : > { %v1119_v33 = vpack.c.bf16 %v1118_v32, %v1118_v32 }
 0x5fb   : > { %1407 = vmatmul.msk.bf16.vlgmr.msrb.gmra.mxu1 %vm1156_vm10, %v1119_v33 }
 0x5fc   : > { %v1116_v34 = vpop.f32.mrf.mxu0 }
 0x678   : > { %v1169_v36 = vpop.f32.mrf.mxu1 }
 0x679   : > { %v1170_v37 = vadd.f32 %v1528_v35, %v1169_v36 }
 0x67b   : > { %v1173_v38 = vadd.f32 %v1170_v37, %v1080_v25 }
 0x67d   : > { %v1176_v39 = vsel %vm635_vm0, %v1173_v38, 0.0 }
 0x67e   : > { %1177 = vadd.xlane.f32.xlu0 %v1176_v39 }
 0x680   : > { %v1171_v40 = vpop.f32.mrf.mxu1 }
 0x6f1   : > { %v1178_v41 = vpop.xlane.xlu0 %1177 }
 0x6f2   : > { %v1179_v42 = vmul.f32 %v1178_v41, %v1053_v1 }
 0x6f4   : > { %v1180_v43 = vsub.f32 %v1173_v38, %v1179_v42 }
 0x6f6   : > { %v1181_v44 = vmul.f32 %v1180_v43, %v1180_v43 }
 0x6f8   : > { %v1182_v45 = vsel %vm635_vm0, %v1181_v44, 0.0 }
 0x6f9   : > { %1183 = vadd.xlane.f32.xlu2 %v1182_v45 }
 0x76c   : > { %v1184_v46 = vpop.xlane.xlu2 %1183 }
 0x76d   : > { %v1185_v47 = vmul.f32 %v1184_v46, %v1053_v1 }
 0x76f   : > { %v1186_v48 = vadd.f32 1e-05, %v1185_v47 }
 0x771   : > { %1551 = vrsqrt.f32 %v1186_v48  ;;  %vm1193_vm12 = vweird.f32 %v1186_v48 }
 0x777   : > { %v1552_v49 = vpop.eup %1551 }
 0x778   : > { %v1188_v50 = vmul.f32 %v1552_v49, %v1186_v48  ;;  %vm1194_vm11 = vweird.f32 %v1552_v49 }
 0x779   : > { %vm1195_vm13 = vmor %vm1193_vm12, %vm1194_vm11 }
 0x77a   : > { %v1189_v51 = vmul.f32 %v1552_v49, %v1188_v50 }
 0x77c   : > { %v1190_v52 = vmul.f32 0.5, %v1189_v51 }
 0x77e   : > { %v1191_v53 = vsub.f32 1.5, %v1190_v52 }
 0x780   : > { %v1192_v54 = vmul.f32 %v1552_v49, %v1191_v53 }
 0x782   : > { %v1196_v56 = vsel %vm1195_vm13, %v1552_v49, %v1192_v54 }
 0x783   : > { %v1197_v57 = vmul.f32 %v1196_v56, %v1180_v43 }
 0x785   : > { %v1201_v59 = vmul.f32 %v1529_v55, %v1197_v57 }
 0x787   : > { %v1205_v60 = vadd.f32 %v1530_v58, %v1201_v59 }
 0x789   : > { %1206 = vst.msk [vmem:[%s603_s23] sm:$0xff] %vm635_vm0, %v1205_v60 }
 0x78a   : > { %1670 = shalt.err (!%p1667_p9)
}
 0x78b   : > { %1438 = dma.vmem_to_hbm [thread:$0]  (%p1873_p4), %s1222_s27, 128, %s1224_s2, %s1208_s28  }
 0x78c PF: > { %s2140_s0 = sld [smem:[#allocation17_spill]] }
 0x78d   : > { %s2141_s29 = sld [smem:[#allocation14_spill]] }
 0x792   : > { %p1460_p10 = scmp.ge.s32.totalorder %s2140_s0, 2 }
 0x793   : > { %s1235_s22 = sand.u32 1, %s2141_s29  }
 0x794   : > { %p1451_p11 = pnand %p1460_p10, %p1880_p8  ;;  %s1236_s24 = scalar_lea.sflag [#allocation6], %s1235_s22 }
 0x796   : > { %p1452_p12 = pneg %p1451_p11 }
 0x798   : > { %1704 = dma.done.wait (%p1452_p12), %s1236_s24, 128  }
 0x799   : > { %1706 = vsyncadd (%p1452_p12), %s1236_s24, 4294967168  ;;  %s32_s29 = sadd.s32 1, %s2140_s0   ;;  %s2143_s23 = sld [smem:[#allocation15_spill]] }
 0x79a   : > { %p29_p13 = scmp.ge.s32.totalorder %s32_s29, 4   ;;  %s2144_s26 = sld [smem:[#allocation21_spill]] }
 0x79b   : > { %s2145_s27 = sld [smem:[#allocation16_spill]]  ;;  %s2147_s24 = smov %s1713_s25 }
 0x79c   : > { %s2146_s28 = sld [smem:[#allocation18_spill]]  ;;  %31 = sbr.rel (!%p29_p13) target bundleno = 14 (0xe), region = 147 }
 0x79f   : > { %s2148_s25 = smov %s2143_s23 }
 0x7a1   :  { %1242 = vsyncpa [#allocation5], 1 }
 0x7a2   :  { %1244 = vsyncpa [#allocation5 + $0x1], 1 }
 0x7a3   :  { %1245 = vsyncpa [#allocation8], 1 }
 0x7a4   :  { %1246 = vsyncpa [#allocation6], 1 }
 0x7a5   :  { %1248 = vsyncpa [#allocation6 + $0x1], 1 }

</bundles_post_ra>
